<compile_context>
chip_gen: v7x
topology: tpu7x:2x2x1
jax: 0.10.0
libtpu: 0.0.40
codegen_flags: <defaults>
</compile_context>

<pallas_src>
import math

import jax
import jax.numpy as jnp
from jax import lax
from jax.experimental import pallas as pl
from jax.experimental.pallas import tpu as pltpu

# ----------------------------- small config ---------------------------------
B = 2              # batch
C = 3              # image channels
IMG = 32           # image spatial size (small stand-in for 224)
P = 8              # patch size (stand-in for 16)
GRID = IMG // P
NPATCH = GRID * GRID            # 16 patches
SEQ = NPATCH + 1                # +1 cls token -> 17
SEQ_PAD = 24                    # padded to a multiple of 8 sublanes
D = 32                          # embed dim == backbone feature_dim
HEADS = 4
HDIM = D // HEADS
MLP = 4 * D                     # 128
DEPTH = 2
OUT_DIM = 48                    # output_dim != feature_dim -> Linear projection
OUT_PAD = 128                   # lane-dense output store
LN_EPS = 1e-6                   # timm ViT LayerNorm eps
CPP = C * P * P                 # 192 flattened patch pixels
NEG_INF = -1.0e30


# ----------------------------- in-kernel math --------------------------------
def _erf_f32(x):
    # Abramowitz & Stegun 7.1.26, |err| <= 1.5e-7; exp/mul/add only (VPU+EUP).
    a1, a2, a3, a4, a5 = 0.254829592, -0.284496736, 1.421413741, -1.453152027, 1.061405429
    p = 0.3275911
    s = jnp.where(x >= 0.0, 1.0, -1.0)
    ax = jnp.abs(x)
    t = 1.0 / (1.0 + p * ax)
    poly = ((((a5 * t + a4) * t + a3) * t + a2) * t + a1) * t
    return s * (1.0 - poly * jnp.exp(-ax * ax))


def _gelu_exact(x):
    # matches torch nn.GELU (erf form) to f32 precision
    return 0.5 * x * (1.0 + _erf_f32(x * 0.7071067811865476))


def _layernorm(x, g, b):
    mu = jnp.mean(x, axis=-1, keepdims=True)
    var = jnp.mean((x - mu) ** 2, axis=-1, keepdims=True)
    return (x - mu) * jax.lax.rsqrt(var + LN_EPS) * g + b


# ----------------------------- fused Pallas kernel ----------------------------
def fused_vit_kernel(patches_ref, patch_w_ref, tokbias_ref, hmask_ref,
                     misc_ref, wqkv_ref, wo_ref, w1_ref, w2_ref, vecs_ref,
                     proj_w_ref, o_ref):
    """Whole VisualEncoder forward for ONE batch element (grid=(B,))."""
    bf16 = jnp.bfloat16

    misc = misc_ref[...]
    fin_g = misc[0:1, :D]
    fin_b = misc[1:2, :D]
    proj_b = misc[2:3, :OUT_PAD]
    key_bias = misc[3:4, :SEQ_PAD]          # 0 on valid keys, -1e30 on pad keys
    hmask = hmask_ref[...]                  # [HEADS*SEQ_PAD, D] block-diag head mask

    # ---- patch embed (Conv2d k=stride=P == matmul) + cls / pos via token bias ----
    x = jnp.dot(patches_ref[0].astype(bf16), patch_w_ref[...],
                preferred_element_type=jnp.float32) + tokbias_ref[...]    # [SEQ_PAD, D]

    # ---- DEPTH pre-norm transformer blocks (static unroll, weights in VMEM) ----
    for i in range(DEPTH):
        vec = vecs_ref[i]                   # [8, 128] packed LN params + biases
        ln1g, ln1b = vec[0:1, :D], vec[1:2, :D]
        ln2g, ln2b = vec[2:3, :D], vec[3:4, :D]
        bqkv = vec[4:5, :3 * D]
        bo = vec[5:6, :D]
        b1 = vec[6:7, :MLP]
        b2 = vec[7:8, :D]

        # ----- attention: x + Wo(MHA(LN1(x))) -----
        xn = _layernorm(x, ln1g, ln1b)
        qkv = jnp.dot(xn.astype(bf16), wqkv_ref[i],
                      preferred_element_type=jnp.float32) + bqkv          # [S, 3D]
        q = qkv[:, 0 * D:1 * D]             # Q columns pre-scaled by 1/sqrt(HDIM)
        k = qkv[:, 1 * D:2 * D]
        v = qkv[:, 2 * D:3 * D]

        # block-diagonal head stacking along sublanes (aligned 24-row blocks):
        # one matmul gives all heads' score matrices stacked on the row axis.
        q_bd = (jnp.concatenate([q] * HEADS, axis=0) * hmask).astype(bf16)  # [H*S, D]
        s = lax.dot_general(q_bd, k.astype(bf16), (((1,), (1,)), ((), ())),
                            preferred_element_type=jnp.float32)           # [H*S, S]
        s = s + key_bias                    # mask padded key columns
        s = s - jnp.max(s, axis=-1, keepdims=True)
        p = jnp.exp(s)
        pn = p * pl.reciprocal(jnp.sum(p, axis=-1, keepdims=True), approx=True)

        pv = jnp.dot(pn.astype(bf16), v.astype(bf16),
                     preferred_element_type=jnp.float32) * hmask          # [H*S, D]
        heads = (pv[0 * SEQ_PAD:1 * SEQ_PAD] + pv[1 * SEQ_PAD:2 * SEQ_PAD]
                 + pv[2 * SEQ_PAD:3 * SEQ_PAD] + pv[3 * SEQ_PAD:4 * SEQ_PAD])  # [S, D]
        attn = jnp.dot(heads.astype(bf16), wo_ref[i],
                       preferred_element_type=jnp.float32)
        x = x + attn + bo

        # ----- MLP: x + fc2(GELU(fc1(LN2(x)))) -----
        xn2 = _layernorm(x, ln2g, ln2b)
        h1 = jnp.dot(xn2.astype(bf16), w1_ref[i],
                     preferred_element_type=jnp.float32) + b1
        h1 = _gelu_exact(h1)
        x = x + jnp.dot(h1.astype(bf16), w2_ref[i],
                        preferred_element_type=jnp.float32) + b2

    # ---- final LN + output projection; lane-dense aligned store ----
    xf = _layernorm(x, fin_g, fin_b)
    y = jnp.dot(xf.astype(bf16), proj_w_ref[...],
                preferred_element_type=jnp.float32) + proj_b              # [S, 128]
    o_ref[0, :, :] = y


# ----------------------------- parameters ------------------------------------
def init_params(key):
    f32, bf16 = jnp.float32, jnp.bfloat16

    def nrm(k, shape, std=0.02):
        return std * jax.random.normal(k, shape, f32)

    keys = jax.random.split(key, 4 + DEPTH)
    scale = 1.0 / math.sqrt(HDIM)

    patch_w = nrm(keys[0], (CPP, D))        # Conv2d weight flattened (c, kh, kw)
    patch_b = jnp.zeros((D,), f32)
    cls = nrm(keys[1], (D,))
    pos = nrm(keys[2], (SEQ, D))
    proj_w = nrm(keys[3], (D, OUT_DIM))
    proj_b = jnp.zeros((OUT_DIM,), f32)

    # per-row additive token bias: row0 = cls + pos0, rows 1..SEQ-1 = conv bias
    # + pos, pad rows = 0 (built outside the kernel -> no in-kernel concat).
    tokbias = jnp.zeros((SEQ_PAD, D), f32)
    tokbias = tokbias.at[0].set(cls + pos[0])
    tokbias = tokbias.at[1:SEQ].set(pos[1:] + patch_b)

    # block-diagonal head mask [HEADS*SEQ_PAD, D]
    row_head = jnp.arange(HEADS * SEQ_PAD) // SEQ_PAD
    col_head = jnp.arange(D) // HDIM
    hmask = (row_head[:, None] == col_head[None, :]).astype(f32)

    # misc tile: row0/1 final LN gamma/beta, row2 padded proj bias, row3 key-mask bias
    misc = jnp.zeros((8, 128), f32)
    misc = misc.at[0, :D].set(1.0)
    misc = misc.at[2, :OUT_DIM].set(proj_b)
    misc = misc.at[3, SEQ:SEQ_PAD].set(NEG_INF)

    wqkv, wo, w1, w2, vecs = [], [], [], [], []
    for i in range(DEPTH):
        bk = jax.random.split(keys[4 + i], 4)
        w_qkv = nrm(bk[0], (D, 3 * D))
        # fold 1/sqrt(HDIM) into the Q columns (Q bias is zero here; a nonzero
        # Q bias would need the same scaling).
        w_qkv = w_qkv.at[:, :D].multiply(scale)
        wqkv.append(w_qkv)
        wo.append(nrm(bk[1], (D, D)))
        w1.append(nrm(bk[2], (D, MLP)))
        w2.append(nrm(bk[3], (MLP, D)))

        vec = jnp.zeros((8, 128), f32)
        vec = vec.at[0, :D].set(1.0)        # LN1 gamma
        vec = vec.at[2, :D].set(1.0)        # LN2 gamma
        # rows 1,3 (LN betas) and 4..7 (qkv/proj/mlp biases) stay zero.
        vecs.append(vec)

    proj_w_pad = jnp.zeros((D, OUT_PAD), f32).at[:, :OUT_DIM].set(proj_w)

    return dict(
        patch_w=patch_w.astype(bf16),
        tokbias=tokbias,
        hmask=hmask,
        misc=misc,
        wqkv=jnp.stack(wqkv).astype(bf16),   # [DEPTH, D, 3D]
        wo=jnp.stack(wo).astype(bf16),       # [DEPTH, D, D]
        w1=jnp.stack(w1).astype(bf16),       # [DEPTH, D, MLP]
        w2=jnp.stack(w2).astype(bf16),       # [DEPTH, MLP, D]
        vecs=jnp.stack(vecs),                # [DEPTH, 8, 128] f32
        proj_w=proj_w_pad.astype(bf16),      # [D, 128]
    )


# ----------------------------- cost estimate ----------------------------------
def _cost_estimate():
    macs_layer = (SEQ_PAD * D * 3 * D                        # qkv
                  + HEADS * SEQ_PAD * D * SEQ_PAD            # scores
                  + HEADS * SEQ_PAD * SEQ_PAD * D            # pv
                  + SEQ_PAD * D * D                          # wo
                  + SEQ_PAD * D * MLP + SEQ_PAD * MLP * D)   # mlp
    macs = B * (SEQ_PAD * CPP * D + DEPTH * macs_layer + SEQ_PAD * D * OUT_PAD)
    trans = B * DEPTH * (HEADS * SEQ_PAD * SEQ_PAD + SEQ_PAD * MLP) + B * SEQ_PAD * 8
    bytes_accessed = (B * SEQ_PAD * CPP * 4 + B * SEQ_PAD * OUT_PAD * 4
                      + (CPP * D + DEPTH * (3 * D * D + D * D + 2 * D * MLP)
                         + D * OUT_PAD) * 2
                      + (SEQ_PAD * D + HEADS * SEQ_PAD * D + (DEPTH + 1) * 8 * 128) * 4)
    return pl.CostEstimate(flops=2 * macs, transcendentals=trans,
                           bytes_accessed=bytes_accessed)


# ----------------------------- forward ----------------------------------------
@jax.jit
def visual_encoder_forward(images, params):
    """images: [B, C, IMG, IMG] float32 (NCHW) -> [B, SEQ, OUT_DIM] float32."""
    # Layout glue only: Conv2d(k=stride=P) == patch matmul.  NCHW -> patches in
    # (c, kh, kw) order, with a zero row in the cls slot and zero rows up to
    # SEQ_PAD so every per-batch slab is sublane-tile aligned inside the kernel.
    x = images.reshape(B, C, GRID, P, GRID, P)
    patches = x.transpose(0, 2, 4, 1, 3, 5).reshape(B, NPATCH, CPP)
    patches = jnp.pad(patches, ((0, 0), (1, SEQ_PAD - SEQ), (0, 0)))

    def full(shape):
        return pl.BlockSpec(shape, lambda b: (0,) * len(shape))

    out = pl.pallas_call(
        fused_vit_kernel,
        grid=(B,),
        in_specs=[
            pl.BlockSpec((1, SEQ_PAD, CPP), lambda b: (b, 0, 0)),   # per-batch patch slab
            full((CPP, D)),                                          # patch_w
            full((SEQ_PAD, D)),                                      # tokbias
            full((HEADS * SEQ_PAD, D)),                              # head mask
            full((8, 128)),                                          # misc
            full((DEPTH, D, 3 * D)),                                 # wqkv
            full((DEPTH, D, D)),                                     # wo
            full((DEPTH, D, MLP)),                                   # w1
            full((DEPTH, MLP, D)),                                   # w2
            full((DEPTH, 8, 128)),                                   # packed LN/bias vecs
            full((D, OUT_PAD)),                                      # proj_w (padded)
        ],
        out_specs=pl.BlockSpec((1, SEQ_PAD, OUT_PAD), lambda b: (b, 0, 0)),
        out_shape=jax.ShapeDtypeStruct((B, SEQ_PAD, OUT_PAD), jnp.float32),
        compiler_params=pltpu.CompilerParams(dimension_semantics=("parallel",)),
        cost_estimate=_cost_estimate(),
    )(patches, params["patch_w"], params["tokbias"], params["hmask"],
      params["misc"], params["wqkv"], params["wo"], params["w1"],
      params["w2"], params["vecs"], params["proj_w"])

    # drop sublane padding rows and lane padding columns
    return out[:, :SEQ, :OUT_DIM]


# ----------------------------- main -------------------------------------------
if __name__ == "__main__":
    key = jax.random.PRNGKey(0)
    k_img, k_param = jax.random.split(key)
    images = jax.random.normal(k_img, (B, C, IMG, IMG), jnp.float32)   # NCHW, like PyTorch
    params = init_params(k_param)

    out = jax.block_until_ready(visual_encoder_forward(images, params))
    assert out.shape == (B, SEQ, OUT_DIM), out.shape
    assert bool(jnp.all(jnp.isfinite(out)))
    print("KERNEL_OK")
</pallas_src>

<mosaic_0001>
module attributes {stable_mosaic.version = 11 : i64} {
  func.func @fused_vit_kernel(%arg0: i32, %arg1: memref<1x24x192xf32, #tpu.memory_space<vmem>>, %arg2: memref<192x32xbf16, #tpu.memory_space<vmem>>, %arg3: memref<24x32xf32, #tpu.memory_space<vmem>>, %arg4: memref<96x32xf32, #tpu.memory_space<vmem>>, %arg5: memref<8x128xf32, #tpu.memory_space<vmem>>, %arg6: memref<2x32x96xbf16, #tpu.memory_space<vmem>>, %arg7: memref<2x32x32xbf16, #tpu.memory_space<vmem>>, %arg8: memref<2x32x128xbf16, #tpu.memory_space<vmem>>, %arg9: memref<2x128x32xbf16, #tpu.memory_space<vmem>>, %arg10: memref<2x8x128xf32, #tpu.memory_space<vmem>>, %arg11: memref<32x128xbf16, #tpu.memory_space<vmem>>, %arg12: memref<1x24x128xf32, #tpu.memory_space<vmem>>) attributes {dimension_semantics = [#tpu.dimension_semantics<parallel>], iteration_bounds = array<i64: 2>, scalar_prefetch = 0 : i64, scratch_operands = 0 : i64, tpu.core_type = #tpu.core_type<tc>, window_params = [{transform_indices = @transform_0, window_bounds = array<i64: 1, 24, 192>}, {pipeline_mode = #tpu.pipeline_mode<synchronous>, transform_indices = @transform_1, window_bounds = array<i64: 192, 32>}, {pipeline_mode = #tpu.pipeline_mode<synchronous>, transform_indices = @transform_2, window_bounds = array<i64: 24, 32>}, {pipeline_mode = #tpu.pipeline_mode<synchronous>, transform_indices = @transform_3, window_bounds = array<i64: 96, 32>}, {pipeline_mode = #tpu.pipeline_mode<synchronous>, transform_indices = @transform_4, window_bounds = array<i64: 8, 128>}, {pipeline_mode = #tpu.pipeline_mode<synchronous>, transform_indices = @transform_5, window_bounds = array<i64: 2, 32, 96>}, {pipeline_mode = #tpu.pipeline_mode<synchronous>, transform_indices = @transform_6, window_bounds = array<i64: 2, 32, 32>}, {pipeline_mode = #tpu.pipeline_mode<synchronous>, transform_indices = @transform_7, window_bounds = array<i64: 2, 32, 128>}, {pipeline_mode = #tpu.pipeline_mode<synchronous>, transform_indices = @transform_8, window_bounds = array<i64: 2, 128, 32>}, {pipeline_mode = #tpu.pipeline_mode<synchronous>, transform_indices = @transform_9, window_bounds = array<i64: 2, 8, 128>}, {pipeline_mode = #tpu.pipeline_mode<synchronous>, transform_indices = @transform_10, window_bounds = array<i64: 32, 128>}, {transform_indices = @transform_11, window_bounds = array<i64: 1, 24, 128>}]} {
    %c0 = arith.constant 0 : index
    %c0_0 = arith.constant 0 : index
    %0 = vector.load %arg5[%c0, %c0_0] : memref<8x128xf32, #tpu.memory_space<vmem>>, vector<8x128xf32>
    %1 = vector.extract_strided_slice %0 {offsets = [0, 0], sizes = [1, 32], strides = [1, 1]} : vector<8x128xf32> to vector<1x32xf32>
    %2 = vector.extract_strided_slice %0 {offsets = [1, 0], sizes = [1, 32], strides = [1, 1]} : vector<8x128xf32> to vector<1x32xf32>
    %3 = vector.extract_strided_slice %0 {offsets = [2, 0], sizes = [1, 128], strides = [1, 1]} : vector<8x128xf32> to vector<1x128xf32>
    %4 = vector.extract_strided_slice %0 {offsets = [3, 0], sizes = [1, 24], strides = [1, 1]} : vector<8x128xf32> to vector<1x24xf32>
    %c0_1 = arith.constant 0 : index
    %c0_2 = arith.constant 0 : index
    %5 = vector.load %arg4[%c0_1, %c0_2] : memref<96x32xf32, #tpu.memory_space<vmem>>, vector<96x32xf32>
    %c0_3 = arith.constant 0 : index
    %c0_4 = arith.constant 0 : index
    %c0_5 = arith.constant 0 : index
    %6 = vector.load %arg1[%c0_3, %c0_4, %c0_5] : memref<1x24x192xf32, #tpu.memory_space<vmem>>, vector<1x24x192xf32>
    %7 = vector.shape_cast %6 : vector<1x24x192xf32> to vector<24x192xf32>
    %8 = arith.truncf %7 : vector<24x192xf32> to vector<24x192xbf16>
    %c0_6 = arith.constant 0 : index
    %c0_7 = arith.constant 0 : index
    %9 = vector.load %arg2[%c0_6, %c0_7] : memref<192x32xbf16, #tpu.memory_space<vmem>>, vector<192x32xbf16>
    %cst = arith.constant dense<0.000000e+00> : vector<24x32xf32>
    %10 = tpu.matmul %8, %9, %cst {dimension_numbers = #tpu.dot_dimension_numbers<[1], [0], [0], [1], [0, 0, 1, 1], [], []>} : vector<24x192xbf16>, vector<192x32xbf16>, vector<24x32xf32> -> vector<24x32xf32>
    %c0_8 = arith.constant 0 : index
    %c0_9 = arith.constant 0 : index
    %11 = vector.load %arg3[%c0_8, %c0_9] : memref<24x32xf32, #tpu.memory_space<vmem>>, vector<24x32xf32>
    %12 = arith.addf %10, %11 : vector<24x32xf32>
    %c0_10 = arith.constant 0 : index
    %c0_11 = arith.constant 0 : index
    %c0_12 = arith.constant 0 : index
    %13 = vector.load %arg10[%c0_10, %c0_11, %c0_12] : memref<2x8x128xf32, #tpu.memory_space<vmem>>, vector<1x8x128xf32>
    %14 = vector.shape_cast %13 : vector<1x8x128xf32> to vector<8x128xf32>
    %15 = vector.extract_strided_slice %14 {offsets = [0, 0], sizes = [1, 32], strides = [1, 1]} : vector<8x128xf32> to vector<1x32xf32>
    %16 = vector.extract_strided_slice %14 {offsets = [1, 0], sizes = [1, 32], strides = [1, 1]} : vector<8x128xf32> to vector<1x32xf32>
    %17 = vector.extract_strided_slice %14 {offsets = [2, 0], sizes = [1, 32], strides = [1, 1]} : vector<8x128xf32> to vector<1x32xf32>
    %18 = vector.extract_strided_slice %14 {offsets = [3, 0], sizes = [1, 32], strides = [1, 1]} : vector<8x128xf32> to vector<1x32xf32>
    %19 = vector.extract_strided_slice %14 {offsets = [4, 0], sizes = [1, 96], strides = [1, 1]} : vector<8x128xf32> to vector<1x96xf32>
    %20 = vector.extract_strided_slice %14 {offsets = [5, 0], sizes = [1, 32], strides = [1, 1]} : vector<8x128xf32> to vector<1x32xf32>
    %21 = vector.extract_strided_slice %14 {offsets = [6, 0], sizes = [1, 128], strides = [1, 1]} : vector<8x128xf32> to vector<1x128xf32>
    %22 = vector.extract_strided_slice %14 {offsets = [7, 0], sizes = [1, 32], strides = [1, 1]} : vector<8x128xf32> to vector<1x32xf32>
    %cst_13 = arith.constant dense<0.000000e+00> : vector<24xf32>
    %23 = vector.multi_reduction <add>, %12, %cst_13 [1] : vector<24x32xf32> to vector<24xf32>
    %24 = vector.shape_cast %23 : vector<24xf32> to vector<24x1xf32>
    %cst_14 = arith.constant 3.200000e+01 : f32
    %25 = vector.broadcast %cst_14 : f32 to vector<24x1xf32>
    %26 = arith.divf %24, %25 : vector<24x1xf32>
    %27 = vector.broadcast %26 : vector<24x1xf32> to vector<24x32xf32>
    %28 = arith.subf %12, %27 : vector<24x32xf32>
    %29 = arith.mulf %28, %28 : vector<24x32xf32>
    %cst_15 = arith.constant dense<0.000000e+00> : vector<24xf32>
    %30 = vector.multi_reduction <add>, %29, %cst_15 [1] : vector<24x32xf32> to vector<24xf32>
    %31 = vector.shape_cast %30 : vector<24xf32> to vector<24x1xf32>
    %cst_16 = arith.constant 3.200000e+01 : f32
    %32 = vector.broadcast %cst_16 : f32 to vector<24x1xf32>
    %33 = arith.divf %31, %32 : vector<24x1xf32>
    %34 = vector.broadcast %26 : vector<24x1xf32> to vector<24x32xf32>
    %35 = arith.subf %12, %34 : vector<24x32xf32>
    %cst_17 = arith.constant 9.99999997E-7 : f32
    %36 = vector.broadcast %cst_17 : f32 to vector<24x1xf32>
    %37 = arith.addf %33, %36 : vector<24x1xf32>
    %38 = math.rsqrt %37 : vector<24x1xf32>
    %39 = vector.broadcast %38 : vector<24x1xf32> to vector<24x32xf32>
    %40 = arith.mulf %35, %39 : vector<24x32xf32>
    %41 = vector.broadcast %15 : vector<1x32xf32> to vector<24x32xf32>
    %42 = arith.mulf %40, %41 : vector<24x32xf32>
    %43 = vector.broadcast %16 : vector<1x32xf32> to vector<24x32xf32>
    %44 = arith.addf %42, %43 : vector<24x32xf32>
    %45 = arith.truncf %44 : vector<24x32xf32> to vector<24x32xbf16>
    %c0_18 = arith.constant 0 : index
    %c0_19 = arith.constant 0 : index
    %c0_20 = arith.constant 0 : index
    %46 = vector.load %arg6[%c0_18, %c0_19, %c0_20] : memref<2x32x96xbf16, #tpu.memory_space<vmem>>, vector<1x32x96xbf16>
    %47 = vector.shape_cast %46 : vector<1x32x96xbf16> to vector<32x96xbf16>
    %cst_21 = arith.constant dense<0.000000e+00> : vector<24x96xf32>
    %48 = tpu.matmul %45, %47, %cst_21 {dimension_numbers = #tpu.dot_dimension_numbers<[1], [0], [0], [1], [0, 0, 1, 1], [], []>} : vector<24x32xbf16>, vector<32x96xbf16>, vector<24x96xf32> -> vector<24x96xf32>
    %49 = vector.broadcast %19 : vector<1x96xf32> to vector<24x96xf32>
    %50 = arith.addf %48, %49 : vector<24x96xf32>
    %51 = vector.extract_strided_slice %50 {offsets = [0, 0], sizes = [24, 32], strides = [1, 1]} : vector<24x96xf32> to vector<24x32xf32>
    %52 = vector.extract_strided_slice %50 {offsets = [0, 32], sizes = [24, 32], strides = [1, 1]} : vector<24x96xf32> to vector<24x32xf32>
    %53 = vector.extract_strided_slice %50 {offsets = [0, 64], sizes = [24, 32], strides = [1, 1]} : vector<24x96xf32> to vector<24x32xf32>
    %54 = tpu.concatenate %51, %51, %51, %51 in 0 : vector<24x32xf32>, vector<24x32xf32>, vector<24x32xf32>, vector<24x32xf32> -> vector<96x32xf32>
    %55 = arith.mulf %54, %5 : vector<96x32xf32>
    %56 = arith.truncf %55 : vector<96x32xf32> to vector<96x32xbf16>
    %57 = arith.truncf %52 : vector<24x32xf32> to vector<24x32xbf16>
    %cst_22 = arith.constant dense<0.000000e+00> : vector<96x24xf32>
    %58 = tpu.matmul %56, %57, %cst_22 {dimension_numbers = #tpu.dot_dimension_numbers<[1], [1], [0], [0], [0, 0, 1, 0], [], []>} : vector<96x32xbf16>, vector<24x32xbf16>, vector<96x24xf32> -> vector<96x24xf32>
    %59 = vector.broadcast %4 : vector<1x24xf32> to vector<96x24xf32>
    %60 = arith.addf %58, %59 : vector<96x24xf32>
    %cst_23 = arith.constant dense<0xFF800000> : vector<96xf32>
    %61 = vector.multi_reduction <maximumf>, %60, %cst_23 [1] : vector<96x24xf32> to vector<96xf32>
    %62 = vector.shape_cast %61 : vector<96xf32> to vector<96x1xf32>
    %63 = vector.broadcast %62 : vector<96x1xf32> to vector<96x24xf32>
    %64 = arith.subf %60, %63 : vector<96x24xf32>
    %65 = math.exp %64 : vector<96x24xf32>
    %cst_24 = arith.constant dense<0.000000e+00> : vector<96xf32>
    %66 = vector.multi_reduction <add>, %65, %cst_24 [1] : vector<96x24xf32> to vector<96xf32>
    %67 = vector.shape_cast %66 : vector<96xf32> to vector<96x1xf32>
    %68 = tpu.reciprocal %67 {approx = true} : vector<96x1xf32> -> vector<96x1xf32>
    %69 = vector.broadcast %68 : vector<96x1xf32> to vector<96x24xf32>
    %70 = arith.mulf %65, %69 : vector<96x24xf32>
    %71 = arith.truncf %70 : vector<96x24xf32> to vector<96x24xbf16>
    %72 = arith.truncf %53 : vector<24x32xf32> to vector<24x32xbf16>
    %cst_25 = arith.constant dense<0.000000e+00> : vector<96x32xf32>
    %73 = tpu.matmul %71, %72, %cst_25 {dimension_numbers = #tpu.dot_dimension_numbers<[1], [0], [0], [1], [0, 0, 1, 1], [], []>} : vector<96x24xbf16>, vector<24x32xbf16>, vector<96x32xf32> -> vector<96x32xf32>
    %74 = arith.mulf %73, %5 : vector<96x32xf32>
    %75 = vector.extract_strided_slice %74 {offsets = [0, 0], sizes = [24, 32], strides = [1, 1]} : vector<96x32xf32> to vector<24x32xf32>
    %76 = vector.extract_strided_slice %74 {offsets = [24, 0], sizes = [24, 32], strides = [1, 1]} : vector<96x32xf32> to vector<24x32xf32>
    %77 = arith.addf %75, %76 : vector<24x32xf32>
    %78 = vector.extract_strided_slice %74 {offsets = [48, 0], sizes = [24, 32], strides = [1, 1]} : vector<96x32xf32> to vector<24x32xf32>
    %79 = arith.addf %77, %78 : vector<24x32xf32>
    %80 = vector.extract_strided_slice %74 {offsets = [72, 0], sizes = [24, 32], strides = [1, 1]} : vector<96x32xf32> to vector<24x32xf32>
    %81 = arith.addf %79, %80 : vector<24x32xf32>
    %82 = arith.truncf %81 : vector<24x32xf32> to vector<24x32xbf16>
    %c0_26 = arith.constant 0 : index
    %c0_27 = arith.constant 0 : index
    %c0_28 = arith.constant 0 : index
    %83 = vector.load %arg7[%c0_26, %c0_27, %c0_28] : memref<2x32x32xbf16, #tpu.memory_space<vmem>>, vector<1x32x32xbf16>
    %84 = vector.shape_cast %83 : vector<1x32x32xbf16> to vector<32x32xbf16>
    %cst_29 = arith.constant dense<0.000000e+00> : vector<24x32xf32>
    %85 = tpu.matmul %82, %84, %cst_29 {dimension_numbers = #tpu.dot_dimension_numbers<[1], [0], [0], [1], [0, 0, 1, 1], [], []>} : vector<24x32xbf16>, vector<32x32xbf16>, vector<24x32xf32> -> vector<24x32xf32>
    %86 = arith.addf %12, %85 : vector<24x32xf32>
    %87 = vector.broadcast %20 : vector<1x32xf32> to vector<24x32xf32>
    %88 = arith.addf %86, %87 : vector<24x32xf32>
    %cst_30 = arith.constant dense<0.000000e+00> : vector<24xf32>
    %89 = vector.multi_reduction <add>, %88, %cst_30 [1] : vector<24x32xf32> to vector<24xf32>
    %90 = vector.shape_cast %89 : vector<24xf32> to vector<24x1xf32>
    %cst_31 = arith.constant 3.200000e+01 : f32
    %91 = vector.broadcast %cst_31 : f32 to vector<24x1xf32>
    %92 = arith.divf %90, %91 : vector<24x1xf32>
    %93 = vector.broadcast %92 : vector<24x1xf32> to vector<24x32xf32>
    %94 = arith.subf %88, %93 : vector<24x32xf32>
    %95 = arith.mulf %94, %94 : vector<24x32xf32>
    %cst_32 = arith.constant dense<0.000000e+00> : vector<24xf32>
    %96 = vector.multi_reduction <add>, %95, %cst_32 [1] : vector<24x32xf32> to vector<24xf32>
    %97 = vector.shape_cast %96 : vector<24xf32> to vector<24x1xf32>
    %cst_33 = arith.constant 3.200000e+01 : f32
    %98 = vector.broadcast %cst_33 : f32 to vector<24x1xf32>
    %99 = arith.divf %97, %98 : vector<24x1xf32>
    %100 = vector.broadcast %92 : vector<24x1xf32> to vector<24x32xf32>
    %101 = arith.subf %88, %100 : vector<24x32xf32>
    %cst_34 = arith.constant 9.99999997E-7 : f32
    %102 = vector.broadcast %cst_34 : f32 to vector<24x1xf32>
    %103 = arith.addf %99, %102 : vector<24x1xf32>
    %104 = math.rsqrt %103 : vector<24x1xf32>
    %105 = vector.broadcast %104 : vector<24x1xf32> to vector<24x32xf32>
    %106 = arith.mulf %101, %105 : vector<24x32xf32>
    %107 = vector.broadcast %17 : vector<1x32xf32> to vector<24x32xf32>
    %108 = arith.mulf %106, %107 : vector<24x32xf32>
    %109 = vector.broadcast %18 : vector<1x32xf32> to vector<24x32xf32>
    %110 = arith.addf %108, %109 : vector<24x32xf32>
    %111 = arith.truncf %110 : vector<24x32xf32> to vector<24x32xbf16>
    %c0_35 = arith.constant 0 : index
    %c0_36 = arith.constant 0 : index
    %c0_37 = arith.constant 0 : index
    %112 = vector.load %arg8[%c0_35, %c0_36, %c0_37] : memref<2x32x128xbf16, #tpu.memory_space<vmem>>, vector<1x32x128xbf16>
    %113 = vector.shape_cast %112 : vector<1x32x128xbf16> to vector<32x128xbf16>
    %cst_38 = arith.constant dense<0.000000e+00> : vector<24x128xf32>
    %114 = tpu.matmul %111, %113, %cst_38 {dimension_numbers = #tpu.dot_dimension_numbers<[1], [0], [0], [1], [0, 0, 1, 1], [], []>} : vector<24x32xbf16>, vector<32x128xbf16>, vector<24x128xf32> -> vector<24x128xf32>
    %115 = vector.broadcast %21 : vector<1x128xf32> to vector<24x128xf32>
    %116 = arith.addf %114, %115 : vector<24x128xf32>
    %cst_39 = arith.constant 5.000000e-01 : f32
    %117 = vector.broadcast %cst_39 : f32 to vector<24x128xf32>
    %118 = arith.mulf %117, %116 : vector<24x128xf32>
    %cst_40 = arith.constant 0.707106769 : f32
    %119 = vector.broadcast %cst_40 : f32 to vector<24x128xf32>
    %120 = arith.mulf %116, %119 : vector<24x128xf32>
    %cst_41 = arith.constant 0.000000e+00 : f32
    %121 = vector.broadcast %cst_41 : f32 to vector<24x128xf32>
    %122 = arith.cmpf oge, %120, %121 : vector<24x128xf32>
    %cst_42 = arith.constant 1.000000e+00 : f32
    %cst_43 = arith.constant -1.000000e+00 : f32
    %123 = vector.broadcast %cst_42 : f32 to vector<24x128xf32>
    %124 = vector.broadcast %cst_43 : f32 to vector<24x128xf32>
    %125 = arith.select %122, %123, %124 : vector<24x128xi1>, vector<24x128xf32>
    %126 = math.absf %120 : vector<24x128xf32>
    %cst_44 = arith.constant 0.327591091 : f32
    %127 = vector.broadcast %cst_44 : f32 to vector<24x128xf32>
    %128 = arith.mulf %127, %126 : vector<24x128xf32>
    %cst_45 = arith.constant 1.000000e+00 : f32
    %129 = vector.broadcast %cst_45 : f32 to vector<24x128xf32>
    %130 = arith.addf %129, %128 : vector<24x128xf32>
    %cst_46 = arith.constant 1.000000e+00 : f32
    %131 = vector.broadcast %cst_46 : f32 to vector<24x128xf32>
    %132 = arith.divf %131, %130 : vector<24x128xf32>
    %cst_47 = arith.constant 1.06140542 : f32
    %133 = vector.broadcast %cst_47 : f32 to vector<24x128xf32>
    %134 = arith.mulf %133, %132 : vector<24x128xf32>
    %cst_48 = arith.constant -1.45315206 : f32
    %135 = vector.broadcast %cst_48 : f32 to vector<24x128xf32>
    %136 = arith.addf %134, %135 : vector<24x128xf32>
    %137 = arith.mulf %136, %132 : vector<24x128xf32>
    %cst_49 = arith.constant 1.42141378 : f32
    %138 = vector.broadcast %cst_49 : f32 to vector<24x128xf32>
    %139 = arith.addf %137, %138 : vector<24x128xf32>
    %140 = arith.mulf %139, %132 : vector<24x128xf32>
    %cst_50 = arith.constant -0.284496725 : f32
    %141 = vector.broadcast %cst_50 : f32 to vector<24x128xf32>
    %142 = arith.addf %140, %141 : vector<24x128xf32>
    %143 = arith.mulf %142, %132 : vector<24x128xf32>
    %cst_51 = arith.constant 0.254829586 : f32
    %144 = vector.broadcast %cst_51 : f32 to vector<24x128xf32>
    %145 = arith.addf %143, %144 : vector<24x128xf32>
    %146 = arith.mulf %145, %132 : vector<24x128xf32>
    %cst_52 = arith.constant 0.000000e+00 : f32
    %147 = vector.broadcast %cst_52 : f32 to vector<24x128xf32>
    %148 = arith.subf %147, %126 : vector<24x128xf32>
    %149 = arith.mulf %148, %126 : vector<24x128xf32>
    %150 = math.exp %149 : vector<24x128xf32>
    %151 = arith.mulf %146, %150 : vector<24x128xf32>
    %cst_53 = arith.constant 1.000000e+00 : f32
    %152 = vector.broadcast %cst_53 : f32 to vector<24x128xf32>
    %153 = arith.subf %152, %151 : vector<24x128xf32>
    %154 = arith.mulf %125, %153 : vector<24x128xf32>
    %cst_54 = arith.constant 1.000000e+00 : f32
    %155 = vector.broadcast %cst_54 : f32 to vector<24x128xf32>
    %156 = arith.addf %155, %154 : vector<24x128xf32>
    %157 = arith.mulf %118, %156 : vector<24x128xf32>
    %158 = arith.truncf %157 : vector<24x128xf32> to vector<24x128xbf16>
    %c0_55 = arith.constant 0 : index
    %c0_56 = arith.constant 0 : index
    %c0_57 = arith.constant 0 : index
    %159 = vector.load %arg9[%c0_55, %c0_56, %c0_57] : memref<2x128x32xbf16, #tpu.memory_space<vmem>>, vector<1x128x32xbf16>
    %160 = vector.shape_cast %159 : vector<1x128x32xbf16> to vector<128x32xbf16>
    %cst_58 = arith.constant dense<0.000000e+00> : vector<24x32xf32>
    %161 = tpu.matmul %158, %160, %cst_58 {dimension_numbers = #tpu.dot_dimension_numbers<[1], [0], [0], [1], [0, 0, 1, 1], [], []>} : vector<24x128xbf16>, vector<128x32xbf16>, vector<24x32xf32> -> vector<24x32xf32>
    %162 = arith.addf %88, %161 : vector<24x32xf32>
    %163 = vector.broadcast %22 : vector<1x32xf32> to vector<24x32xf32>
    %164 = arith.addf %162, %163 : vector<24x32xf32>
    %c1 = arith.constant 1 : index
    %c0_59 = arith.constant 0 : index
    %c0_60 = arith.constant 0 : index
    %165 = vector.load %arg10[%c1, %c0_59, %c0_60] : memref<2x8x128xf32, #tpu.memory_space<vmem>>, vector<1x8x128xf32>
    %166 = vector.shape_cast %165 : vector<1x8x128xf32> to vector<8x128xf32>
    %167 = vector.extract_strided_slice %166 {offsets = [0, 0], sizes = [1, 32], strides = [1, 1]} : vector<8x128xf32> to vector<1x32xf32>
    %168 = vector.extract_strided_slice %166 {offsets = [1, 0], sizes = [1, 32], strides = [1, 1]} : vector<8x128xf32> to vector<1x32xf32>
    %169 = vector.extract_strided_slice %166 {offsets = [2, 0], sizes = [1, 32], strides = [1, 1]} : vector<8x128xf32> to vector<1x32xf32>
    %170 = vector.extract_strided_slice %166 {offsets = [3, 0], sizes = [1, 32], strides = [1, 1]} : vector<8x128xf32> to vector<1x32xf32>
    %171 = vector.extract_strided_slice %166 {offsets = [4, 0], sizes = [1, 96], strides = [1, 1]} : vector<8x128xf32> to vector<1x96xf32>
    %172 = vector.extract_strided_slice %166 {offsets = [5, 0], sizes = [1, 32], strides = [1, 1]} : vector<8x128xf32> to vector<1x32xf32>
    %173 = vector.extract_strided_slice %166 {offsets = [6, 0], sizes = [1, 128], strides = [1, 1]} : vector<8x128xf32> to vector<1x128xf32>
    %174 = vector.extract_strided_slice %166 {offsets = [7, 0], sizes = [1, 32], strides = [1, 1]} : vector<8x128xf32> to vector<1x32xf32>
    %cst_61 = arith.constant dense<0.000000e+00> : vector<24xf32>
    %175 = vector.multi_reduction <add>, %164, %cst_61 [1] : vector<24x32xf32> to vector<24xf32>
    %176 = vector.shape_cast %175 : vector<24xf32> to vector<24x1xf32>
    %cst_62 = arith.constant 3.200000e+01 : f32
    %177 = vector.broadcast %cst_62 : f32 to vector<24x1xf32>
    %178 = arith.divf %176, %177 : vector<24x1xf32>
    %179 = vector.broadcast %178 : vector<24x1xf32> to vector<24x32xf32>
    %180 = arith.subf %164, %179 : vector<24x32xf32>
    %181 = arith.mulf %180, %180 : vector<24x32xf32>
    %cst_63 = arith.constant dense<0.000000e+00> : vector<24xf32>
    %182 = vector.multi_reduction <add>, %181, %cst_63 [1] : vector<24x32xf32> to vector<24xf32>
    %183 = vector.shape_cast %182 : vector<24xf32> to vector<24x1xf32>
    %cst_64 = arith.constant 3.200000e+01 : f32
    %184 = vector.broadcast %cst_64 : f32 to vector<24x1xf32>
    %185 = arith.divf %183, %184 : vector<24x1xf32>
    %186 = vector.broadcast %178 : vector<24x1xf32> to vector<24x32xf32>
    %187 = arith.subf %164, %186 : vector<24x32xf32>
    %cst_65 = arith.constant 9.99999997E-7 : f32
    %188 = vector.broadcast %cst_65 : f32 to vector<24x1xf32>
    %189 = arith.addf %185, %188 : vector<24x1xf32>
    %190 = math.rsqrt %189 : vector<24x1xf32>
    %191 = vector.broadcast %190 : vector<24x1xf32> to vector<24x32xf32>
    %192 = arith.mulf %187, %191 : vector<24x32xf32>
    %193 = vector.broadcast %167 : vector<1x32xf32> to vector<24x32xf32>
    %194 = arith.mulf %192, %193 : vector<24x32xf32>
    %195 = vector.broadcast %168 : vector<1x32xf32> to vector<24x32xf32>
    %196 = arith.addf %194, %195 : vector<24x32xf32>
    %197 = arith.truncf %196 : vector<24x32xf32> to vector<24x32xbf16>
    %c1_66 = arith.constant 1 : index
    %c0_67 = arith.constant 0 : index
    %c0_68 = arith.constant 0 : index
    %198 = vector.load %arg6[%c1_66, %c0_67, %c0_68] : memref<2x32x96xbf16, #tpu.memory_space<vmem>>, vector<1x32x96xbf16>
    %199 = vector.shape_cast %198 : vector<1x32x96xbf16> to vector<32x96xbf16>
    %cst_69 = arith.constant dense<0.000000e+00> : vector<24x96xf32>
    %200 = tpu.matmul %197, %199, %cst_69 {dimension_numbers = #tpu.dot_dimension_numbers<[1], [0], [0], [1], [0, 0, 1, 1], [], []>} : vector<24x32xbf16>, vector<32x96xbf16>, vector<24x96xf32> -> vector<24x96xf32>
    %201 = vector.broadcast %171 : vector<1x96xf32> to vector<24x96xf32>
    %202 = arith.addf %200, %201 : vector<24x96xf32>
    %203 = vector.extract_strided_slice %202 {offsets = [0, 0], sizes = [24, 32], strides = [1, 1]} : vector<24x96xf32> to vector<24x32xf32>
    %204 = vector.extract_strided_slice %202 {offsets = [0, 32], sizes = [24, 32], strides = [1, 1]} : vector<24x96xf32> to vector<24x32xf32>
    %205 = vector.extract_strided_slice %202 {offsets = [0, 64], sizes = [24, 32], strides = [1, 1]} : vector<24x96xf32> to vector<24x32xf32>
    %206 = tpu.concatenate %203, %203, %203, %203 in 0 : vector<24x32xf32>, vector<24x32xf32>, vector<24x32xf32>, vector<24x32xf32> -> vector<96x32xf32>
    %207 = arith.mulf %206, %5 : vector<96x32xf32>
    %208 = arith.truncf %207 : vector<96x32xf32> to vector<96x32xbf16>
    %209 = arith.truncf %204 : vector<24x32xf32> to vector<24x32xbf16>
    %cst_70 = arith.constant dense<0.000000e+00> : vector<96x24xf32>
    %210 = tpu.matmul %208, %209, %cst_70 {dimension_numbers = #tpu.dot_dimension_numbers<[1], [1], [0], [0], [0, 0, 1, 0], [], []>} : vector<96x32xbf16>, vector<24x32xbf16>, vector<96x24xf32> -> vector<96x24xf32>
    %211 = vector.broadcast %4 : vector<1x24xf32> to vector<96x24xf32>
    %212 = arith.addf %210, %211 : vector<96x24xf32>
    %cst_71 = arith.constant dense<0xFF800000> : vector<96xf32>
    %213 = vector.multi_reduction <maximumf>, %212, %cst_71 [1] : vector<96x24xf32> to vector<96xf32>
    %214 = vector.shape_cast %213 : vector<96xf32> to vector<96x1xf32>
    %215 = vector.broadcast %214 : vector<96x1xf32> to vector<96x24xf32>
    %216 = arith.subf %212, %215 : vector<96x24xf32>
    %217 = math.exp %216 : vector<96x24xf32>
    %cst_72 = arith.constant dense<0.000000e+00> : vector<96xf32>
    %218 = vector.multi_reduction <add>, %217, %cst_72 [1] : vector<96x24xf32> to vector<96xf32>
    %219 = vector.shape_cast %218 : vector<96xf32> to vector<96x1xf32>
    %220 = tpu.reciprocal %219 {approx = true} : vector<96x1xf32> -> vector<96x1xf32>
    %221 = vector.broadcast %220 : vector<96x1xf32> to vector<96x24xf32>
    %222 = arith.mulf %217, %221 : vector<96x24xf32>
    %223 = arith.truncf %222 : vector<96x24xf32> to vector<96x24xbf16>
    %224 = arith.truncf %205 : vector<24x32xf32> to vector<24x32xbf16>
    %cst_73 = arith.constant dense<0.000000e+00> : vector<96x32xf32>
    %225 = tpu.matmul %223, %224, %cst_73 {dimension_numbers = #tpu.dot_dimension_numbers<[1], [0], [0], [1], [0, 0, 1, 1], [], []>} : vector<96x24xbf16>, vector<24x32xbf16>, vector<96x32xf32> -> vector<96x32xf32>
    %226 = arith.mulf %225, %5 : vector<96x32xf32>
    %227 = vector.extract_strided_slice %226 {offsets = [0, 0], sizes = [24, 32], strides = [1, 1]} : vector<96x32xf32> to vector<24x32xf32>
    %228 = vector.extract_strided_slice %226 {offsets = [24, 0], sizes = [24, 32], strides = [1, 1]} : vector<96x32xf32> to vector<24x32xf32>
    %229 = arith.addf %227, %228 : vector<24x32xf32>
    %230 = vector.extract_strided_slice %226 {offsets = [48, 0], sizes = [24, 32], strides = [1, 1]} : vector<96x32xf32> to vector<24x32xf32>
    %231 = arith.addf %229, %230 : vector<24x32xf32>
    %232 = vector.extract_strided_slice %226 {offsets = [72, 0], sizes = [24, 32], strides = [1, 1]} : vector<96x32xf32> to vector<24x32xf32>
    %233 = arith.addf %231, %232 : vector<24x32xf32>
    %234 = arith.truncf %233 : vector<24x32xf32> to vector<24x32xbf16>
    %c1_74 = arith.constant 1 : index
    %c0_75 = arith.constant 0 : index
    %c0_76 = arith.constant 0 : index
    %235 = vector.load %arg7[%c1_74, %c0_75, %c0_76] : memref<2x32x32xbf16, #tpu.memory_space<vmem>>, vector<1x32x32xbf16>
    %236 = vector.shape_cast %235 : vector<1x32x32xbf16> to vector<32x32xbf16>
    %cst_77 = arith.constant dense<0.000000e+00> : vector<24x32xf32>
    %237 = tpu.matmul %234, %236, %cst_77 {dimension_numbers = #tpu.dot_dimension_numbers<[1], [0], [0], [1], [0, 0, 1, 1], [], []>} : vector<24x32xbf16>, vector<32x32xbf16>, vector<24x32xf32> -> vector<24x32xf32>
    %238 = arith.addf %164, %237 : vector<24x32xf32>
    %239 = vector.broadcast %172 : vector<1x32xf32> to vector<24x32xf32>
    %240 = arith.addf %238, %239 : vector<24x32xf32>
    %cst_78 = arith.constant dense<0.000000e+00> : vector<24xf32>
    %241 = vector.multi_reduction <add>, %240, %cst_78 [1] : vector<24x32xf32> to vector<24xf32>
    %242 = vector.shape_cast %241 : vector<24xf32> to vector<24x1xf32>
    %cst_79 = arith.constant 3.200000e+01 : f32
    %243 = vector.broadcast %cst_79 : f32 to vector<24x1xf32>
    %244 = arith.divf %242, %243 : vector<24x1xf32>
    %245 = vector.broadcast %244 : vector<24x1xf32> to vector<24x32xf32>
    %246 = arith.subf %240, %245 : vector<24x32xf32>
    %247 = arith.mulf %246, %246 : vector<24x32xf32>
    %cst_80 = arith.constant dense<0.000000e+00> : vector<24xf32>
    %248 = vector.multi_reduction <add>, %247, %cst_80 [1] : vector<24x32xf32> to vector<24xf32>
    %249 = vector.shape_cast %248 : vector<24xf32> to vector<24x1xf32>
    %cst_81 = arith.constant 3.200000e+01 : f32
    %250 = vector.broadcast %cst_81 : f32 to vector<24x1xf32>
    %251 = arith.divf %249, %250 : vector<24x1xf32>
    %252 = vector.broadcast %244 : vector<24x1xf32> to vector<24x32xf32>
    %253 = arith.subf %240, %252 : vector<24x32xf32>
    %cst_82 = arith.constant 9.99999997E-7 : f32
    %254 = vector.broadcast %cst_82 : f32 to vector<24x1xf32>
    %255 = arith.addf %251, %254 : vector<24x1xf32>
    %256 = math.rsqrt %255 : vector<24x1xf32>
    %257 = vector.broadcast %256 : vector<24x1xf32> to vector<24x32xf32>
    %258 = arith.mulf %253, %257 : vector<24x32xf32>
    %259 = vector.broadcast %169 : vector<1x32xf32> to vector<24x32xf32>
    %260 = arith.mulf %258, %259 : vector<24x32xf32>
    %261 = vector.broadcast %170 : vector<1x32xf32> to vector<24x32xf32>
    %262 = arith.addf %260, %261 : vector<24x32xf32>
    %263 = arith.truncf %262 : vector<24x32xf32> to vector<24x32xbf16>
    %c1_83 = arith.constant 1 : index
    %c0_84 = arith.constant 0 : index
    %c0_85 = arith.constant 0 : index
    %264 = vector.load %arg8[%c1_83, %c0_84, %c0_85] : memref<2x32x128xbf16, #tpu.memory_space<vmem>>, vector<1x32x128xbf16>
    %265 = vector.shape_cast %264 : vector<1x32x128xbf16> to vector<32x128xbf16>
    %cst_86 = arith.constant dense<0.000000e+00> : vector<24x128xf32>
    %266 = tpu.matmul %263, %265, %cst_86 {dimension_numbers = #tpu.dot_dimension_numbers<[1], [0], [0], [1], [0, 0, 1, 1], [], []>} : vector<24x32xbf16>, vector<32x128xbf16>, vector<24x128xf32> -> vector<24x128xf32>
    %267 = vector.broadcast %173 : vector<1x128xf32> to vector<24x128xf32>
    %268 = arith.addf %266, %267 : vector<24x128xf32>
    %cst_87 = arith.constant 5.000000e-01 : f32
    %269 = vector.broadcast %cst_87 : f32 to vector<24x128xf32>
    %270 = arith.mulf %269, %268 : vector<24x128xf32>
    %cst_88 = arith.constant 0.707106769 : f32
    %271 = vector.broadcast %cst_88 : f32 to vector<24x128xf32>
    %272 = arith.mulf %268, %271 : vector<24x128xf32>
    %cst_89 = arith.constant 0.000000e+00 : f32
    %273 = vector.broadcast %cst_89 : f32 to vector<24x128xf32>
    %274 = arith.cmpf oge, %272, %273 : vector<24x128xf32>
    %cst_90 = arith.constant 1.000000e+00 : f32
    %cst_91 = arith.constant -1.000000e+00 : f32
    %275 = vector.broadcast %cst_90 : f32 to vector<24x128xf32>
    %276 = vector.broadcast %cst_91 : f32 to vector<24x128xf32>
    %277 = arith.select %274, %275, %276 : vector<24x128xi1>, vector<24x128xf32>
    %278 = math.absf %272 : vector<24x128xf32>
    %cst_92 = arith.constant 0.327591091 : f32
    %279 = vector.broadcast %cst_92 : f32 to vector<24x128xf32>
    %280 = arith.mulf %279, %278 : vector<24x128xf32>
    %cst_93 = arith.constant 1.000000e+00 : f32
    %281 = vector.broadcast %cst_93 : f32 to vector<24x128xf32>
    %282 = arith.addf %281, %280 : vector<24x128xf32>
    %cst_94 = arith.constant 1.000000e+00 : f32
    %283 = vector.broadcast %cst_94 : f32 to vector<24x128xf32>
    %284 = arith.divf %283, %282 : vector<24x128xf32>
    %cst_95 = arith.constant 1.06140542 : f32
    %285 = vector.broadcast %cst_95 : f32 to vector<24x128xf32>
    %286 = arith.mulf %285, %284 : vector<24x128xf32>
    %cst_96 = arith.constant -1.45315206 : f32
    %287 = vector.broadcast %cst_96 : f32 to vector<24x128xf32>
    %288 = arith.addf %286, %287 : vector<24x128xf32>
    %289 = arith.mulf %288, %284 : vector<24x128xf32>
    %cst_97 = arith.constant 1.42141378 : f32
    %290 = vector.broadcast %cst_97 : f32 to vector<24x128xf32>
    %291 = arith.addf %289, %290 : vector<24x128xf32>
    %292 = arith.mulf %291, %284 : vector<24x128xf32>
    %cst_98 = arith.constant -0.284496725 : f32
    %293 = vector.broadcast %cst_98 : f32 to vector<24x128xf32>
    %294 = arith.addf %292, %293 : vector<24x128xf32>
    %295 = arith.mulf %294, %284 : vector<24x128xf32>
    %cst_99 = arith.constant 0.254829586 : f32
    %296 = vector.broadcast %cst_99 : f32 to vector<24x128xf32>
    %297 = arith.addf %295, %296 : vector<24x128xf32>
    %298 = arith.mulf %297, %284 : vector<24x128xf32>
    %cst_100 = arith.constant 0.000000e+00 : f32
    %299 = vector.broadcast %cst_100 : f32 to vector<24x128xf32>
    %300 = arith.subf %299, %278 : vector<24x128xf32>
    %301 = arith.mulf %300, %278 : vector<24x128xf32>
    %302 = math.exp %301 : vector<24x128xf32>
    %303 = arith.mulf %298, %302 : vector<24x128xf32>
    %cst_101 = arith.constant 1.000000e+00 : f32
    %304 = vector.broadcast %cst_101 : f32 to vector<24x128xf32>
    %305 = arith.subf %304, %303 : vector<24x128xf32>
    %306 = arith.mulf %277, %305 : vector<24x128xf32>
    %cst_102 = arith.constant 1.000000e+00 : f32
    %307 = vector.broadcast %cst_102 : f32 to vector<24x128xf32>
    %308 = arith.addf %307, %306 : vector<24x128xf32>
    %309 = arith.mulf %270, %308 : vector<24x128xf32>
    %310 = arith.truncf %309 : vector<24x128xf32> to vector<24x128xbf16>
    %c1_103 = arith.constant 1 : index
    %c0_104 = arith.constant 0 : index
    %c0_105 = arith.constant 0 : index
    %311 = vector.load %arg9[%c1_103, %c0_104, %c0_105] : memref<2x128x32xbf16, #tpu.memory_space<vmem>>, vector<1x128x32xbf16>
    %312 = vector.shape_cast %311 : vector<1x128x32xbf16> to vector<128x32xbf16>
    %cst_106 = arith.constant dense<0.000000e+00> : vector<24x32xf32>
    %313 = tpu.matmul %310, %312, %cst_106 {dimension_numbers = #tpu.dot_dimension_numbers<[1], [0], [0], [1], [0, 0, 1, 1], [], []>} : vector<24x128xbf16>, vector<128x32xbf16>, vector<24x32xf32> -> vector<24x32xf32>
    %314 = arith.addf %240, %313 : vector<24x32xf32>
    %315 = vector.broadcast %174 : vector<1x32xf32> to vector<24x32xf32>
    %316 = arith.addf %314, %315 : vector<24x32xf32>
    %cst_107 = arith.constant dense<0.000000e+00> : vector<24xf32>
    %317 = vector.multi_reduction <add>, %316, %cst_107 [1] : vector<24x32xf32> to vector<24xf32>
    %318 = vector.shape_cast %317 : vector<24xf32> to vector<24x1xf32>
    %cst_108 = arith.constant 3.200000e+01 : f32
    %319 = vector.broadcast %cst_108 : f32 to vector<24x1xf32>
    %320 = arith.divf %318, %319 : vector<24x1xf32>
    %321 = vector.broadcast %320 : vector<24x1xf32> to vector<24x32xf32>
    %322 = arith.subf %316, %321 : vector<24x32xf32>
    %323 = arith.mulf %322, %322 : vector<24x32xf32>
    %cst_109 = arith.constant dense<0.000000e+00> : vector<24xf32>
    %324 = vector.multi_reduction <add>, %323, %cst_109 [1] : vector<24x32xf32> to vector<24xf32>
    %325 = vector.shape_cast %324 : vector<24xf32> to vector<24x1xf32>
    %cst_110 = arith.constant 3.200000e+01 : f32
    %326 = vector.broadcast %cst_110 : f32 to vector<24x1xf32>
    %327 = arith.divf %325, %326 : vector<24x1xf32>
    %328 = vector.broadcast %320 : vector<24x1xf32> to vector<24x32xf32>
    %329 = arith.subf %316, %328 : vector<24x32xf32>
    %cst_111 = arith.constant 9.99999997E-7 : f32
    %330 = vector.broadcast %cst_111 : f32 to vector<24x1xf32>
    %331 = arith.addf %327, %330 : vector<24x1xf32>
    %332 = math.rsqrt %331 : vector<24x1xf32>
    %333 = vector.broadcast %332 : vector<24x1xf32> to vector<24x32xf32>
    %334 = arith.mulf %329, %333 : vector<24x32xf32>
    %335 = vector.broadcast %1 : vector<1x32xf32> to vector<24x32xf32>
    %336 = arith.mulf %334, %335 : vector<24x32xf32>
    %337 = vector.broadcast %2 : vector<1x32xf32> to vector<24x32xf32>
    %338 = arith.addf %336, %337 : vector<24x32xf32>
    %339 = arith.truncf %338 : vector<24x32xf32> to vector<24x32xbf16>
    %c0_112 = arith.constant 0 : index
    %c0_113 = arith.constant 0 : index
    %340 = vector.load %arg11[%c0_112, %c0_113] : memref<32x128xbf16, #tpu.memory_space<vmem>>, vector<32x128xbf16>
    %cst_114 = arith.constant dense<0.000000e+00> : vector<24x128xf32>
    %341 = tpu.matmul %339, %340, %cst_114 {dimension_numbers = #tpu.dot_dimension_numbers<[1], [0], [0], [1], [0, 0, 1, 1], [], []>} : vector<24x32xbf16>, vector<32x128xbf16>, vector<24x128xf32> -> vector<24x128xf32>
    %342 = vector.broadcast %3 : vector<1x128xf32> to vector<24x128xf32>
    %343 = arith.addf %341, %342 : vector<24x128xf32>
    %c0_115 = arith.constant 0 : index
    %c0_116 = arith.constant 0 : index
    %c0_117 = arith.constant 0 : index
    %344 = vector.load %arg12[%c0_115, %c0_116, %c0_117] : memref<1x24x128xf32, #tpu.memory_space<vmem>>, vector<1x24x128xf32>
    %345 = vector.shape_cast %344 : vector<1x24x128xf32> to vector<24x128xf32>
    %346 = vector.shape_cast %343 : vector<24x128xf32> to vector<1x24x128xf32>
    tpu.vector_store %arg12[%c0_115, %c0_116, %c0_117], %346 {strides = array<i32>} : memref<1x24x128xf32, #tpu.memory_space<vmem>>, vector<1x24x128xf32>,
    return
  }
  func.func @transform_0(%arg0: i32) -> (i32, i32, i32) {
    %c0_i32 = arith.constant 0 : i32
    %c0_i32_0 = arith.constant 0 : i32
    %c0_i32_1 = arith.constant 0 : i32
    return %arg0, %c0_i32, %c0_i32_0 : i32, i32, i32
  }
  func.func @transform_1(%arg0: i32) -> (i32, i32) {
    %c0_i32 = arith.constant 0 : i32
    %c0_i32_0 = arith.constant 0 : i32
    %c0_i32_1 = arith.constant 0 : i32
    return %c0_i32, %c0_i32_0 : i32, i32
  }
  func.func @transform_2(%arg0: i32) -> (i32, i32) {
    %c0_i32 = arith.constant 0 : i32
    %c0_i32_0 = arith.constant 0 : i32
    %c0_i32_1 = arith.constant 0 : i32
    return %c0_i32, %c0_i32_0 : i32, i32
  }
  func.func @transform_3(%arg0: i32) -> (i32, i32) {
    %c0_i32 = arith.constant 0 : i32
    %c0_i32_0 = arith.constant 0 : i32
    %c0_i32_1 = arith.constant 0 : i32
    return %c0_i32, %c0_i32_0 : i32, i32
  }
  func.func @transform_4(%arg0: i32) -> (i32, i32) {
    %c0_i32 = arith.constant 0 : i32
    %c0_i32_0 = arith.constant 0 : i32
    %c0_i32_1 = arith.constant 0 : i32
    return %c0_i32, %c0_i32_0 : i32, i32
  }
  func.func @transform_5(%arg0: i32) -> (i32, i32, i32) {
    %c0_i32 = arith.constant 0 : i32
    %c0_i32_0 = arith.constant 0 : i32
    %c0_i32_1 = arith.constant 0 : i32
    %c0_i32_2 = arith.constant 0 : i32
    return %c0_i32, %c0_i32_0, %c0_i32_1 : i32, i32, i32
  }
  func.func @transform_6(%arg0: i32) -> (i32, i32, i32) {
    %c0_i32 = arith.constant 0 : i32
    %c0_i32_0 = arith.constant 0 : i32
    %c0_i32_1 = arith.constant 0 : i32
    %c0_i32_2 = arith.constant 0 : i32
    return %c0_i32, %c0_i32_0, %c0_i32_1 : i32, i32, i32
  }
  func.func @transform_7(%arg0: i32) -> (i32, i32, i32) {
    %c0_i32 = arith.constant 0 : i32
    %c0_i32_0 = arith.constant 0 : i32
    %c0_i32_1 = arith.constant 0 : i32
    %c0_i32_2 = arith.constant 0 : i32
    return %c0_i32, %c0_i32_0, %c0_i32_1 : i32, i32, i32
  }
  func.func @transform_8(%arg0: i32) -> (i32, i32, i32) {
    %c0_i32 = arith.constant 0 : i32
    %c0_i32_0 = arith.constant 0 : i32
    %c0_i32_1 = arith.constant 0 : i32
    %c0_i32_2 = arith.constant 0 : i32
    return %c0_i32, %c0_i32_0, %c0_i32_1 : i32, i32, i32
  }
  func.func @transform_9(%arg0: i32) -> (i32, i32, i32) {
    %c0_i32 = arith.constant 0 : i32
    %c0_i32_0 = arith.constant 0 : i32
    %c0_i32_1 = arith.constant 0 : i32
    %c0_i32_2 = arith.constant 0 : i32
    return %c0_i32, %c0_i32_0, %c0_i32_1 : i32, i32, i32
  }
  func.func @transform_10(%arg0: i32) -> (i32, i32) {
    %c0_i32 = arith.constant 0 : i32
    %c0_i32_0 = arith.constant 0 : i32
    %c0_i32_1 = arith.constant 0 : i32
    return %c0_i32, %c0_i32_0 : i32, i32
  }
  func.func @transform_11(%arg0: i32) -> (i32, i32, i32) {
    %c0_i32 = arith.constant 0 : i32
    %c0_i32_0 = arith.constant 0 : i32
    %c0_i32_1 = arith.constant 0 : i32
    return %arg0, %c0_i32, %c0_i32_0 : i32, i32, i32
  }
}

</mosaic_0001>

<bundles_post_ra>
// kernel: visual_encoder_forward.1
= control target key start
LH: loop header
LB: loop body
LE: loop exit
PB: predicated region body
PF: predicated region fallthrough
CT: control target
= control target key end

     0   :  { %s3309_s17 = smov 0   ;;  %s4107_s0 = inlined_call_operand.vmem [shape: f32[2,24,192], index: 0, kind: input, shape index: {}]   ;;  %s4108_s1 = inlined_call_operand.vmem [shape: bf16[192,32], index: 1, kind: input, shape index: {}]   ;;  %s4109_s2 = inlined_call_operand.vmem [shape: f32[24,32], index: 2, kind: input, shape index: {}]   ;;  %s4110_s3 = inlined_call_operand.vmem [shape: f32[96,32], index: 3, kind: input, shape index: {}]   ;;  %s4111_s4 = inlined_call_operand.vmem [shape: f32[8,128], index: 4, kind: input, shape index: {}]   ;;  %s4112_s5 = inlined_call_operand.vmem [shape: bf16[2,32,96], index: 5, kind: input, shape index: {}]   ;;  %s4113_s6 = inlined_call_operand.vmem [shape: bf16[2,32,32], index: 6, kind: input, shape index: {}]   ;;  %s4114_s7 = inlined_call_operand.vmem [shape: bf16[2,32,128], index: 7, kind: input, shape index: {}]   ;;  %s4115_s8 = inlined_call_operand.vmem [shape: bf16[2,128,32], index: 8, kind: input, shape index: {}]   ;;  %s4116_s9 = inlined_call_operand.vmem [shape: f32[2,8,128], index: 9, kind: input, shape index: {}]   ;;  %s4117_s10 = inlined_call_operand.vmem [shape: bf16[32,128], index: 10, kind: input, shape index: {}]   ;;  %s4118_s11 = inlined_call_operand.vmem [shape: f32[2,24,128], index: 11, kind: output, shape index: {}]  }
   0x1 LB: > { %s2651_s18 = sadd.s32 4294967295, %s3243_s17   ;;  %p2655_p0 = scmp.ge.s32.totalorder %s3243_s17, 1  ;;  %s3243_s17 = sphi %s3309_s17, %s21_s17  }
   0x2   : > { %p337_p1 = scmp.lt.s32.totalorder %s3243_s17, 3 }
   0x4   : > { %p338_p2 = pnand %p2655_p0, %p337_p1 }
   0x5   : > { %v3031_v0 = vld [vmem:[%s4108_s1] sm:$0xff] (!%p338_p2)   ;;  %v3245_v1 = vmov (!%p338_p2), 0   ;;  %p377_p3 = scmp.lt.s32.totalorder (!%p338_p2), %s2651_s18, 1  ;;  %v3032_v2 = vld [vmem:[%s4108_s1 + $0x8] sm:$0xff] (!%p338_p2)   ;;  %v3033_v3 = vld [vmem:[%s4108_s1 + $0x10] sm:$0xff] (!%p338_p2)   ;;  %vm510_vm0 = vcmask (!%p338_p2), 523264   ;;  %v607_v61 = vlaneseq (!%p338_p2) }
   0x6   : > { %341 = sbr.rel (%p338_p2) target bundleno = 5775 (0x168f), region = 64  ;;  %517 = vmatprep.subr.bf16.mxu0 (!%p338_p2), %v3245_v1  ;;  %v3034_v4 = vld [vmem:[%s4108_s1 + $0x18] sm:$0xff] (!%p338_p2)   ;;  %v3035_v8 = vld [vmem:[%s4108_s1 + $0x20] sm:$0xff] (!%p338_p2)   ;;  %v3036_v9 = vld [vmem:[%s4108_s1 + $0x28] sm:$0xff] (!%p338_p2)   ;;  %vm566_vm1 = vcmask (!%p338_p2), 261120   ;;  %s3246_s14 = smov (!%p338_p2), 96  }
   0x7   : > { %518 = vmatpush1.bf16.msra.mxu0 (!%p338_p2), %v3031_v0  ;;  %v3037_v10 = vld [vmem:[%s4108_s1 + $0x30] sm:$0xff] (!%p338_p2)   ;;  %v3038_v11 = vld [vmem:[%s4108_s1 + $0x38] sm:$0xff] (!%p338_p2)   ;;  %v3039_v12 = vld [vmem:[%s4108_s1 + $0x40] sm:$0xff] (!%p338_p2)   ;;  %v3402_v0 = vshrl.u32 (!%p338_p2), %v607_v61, 7  ;;  %vm832_vm2 = vcmask (!%p338_p2), 195584   ;;  %s3247_s16 = smov (!%p338_p2), 64  }
   0x8   : > { %519 = vmatprep.subr.bf16.mxu0 (!%p338_p2), %v3245_v1  ;;  %v3040_v13 = vld [vmem:[%s4108_s1 + $0x48] sm:$0xff] (!%p338_p2)   ;;  %v3041_v14 = vld [vmem:[%s4108_s1 + $0x50] sm:$0xff] (!%p338_p2)   ;;  %v3042_v15 = vld [vmem:[%s4108_s1 + $0x58] sm:$0xff] (!%p338_p2)   ;;  %vm994_vm3 = vcmask (!%p338_p2), 1043456  }
   0x9   : > { %v435_v23 = vld [vmem:[%s4109_s2] sm:$0xff] (!%p338_p2)  ;;  %v436_v25 = vld [vmem:[%s4109_s2 + $0x8] sm:$0xff] (!%p338_p2)  ;;  %v437_v32 = vld [vmem:[%s4109_s2 + $0x10] sm:$0xff] (!%p338_p2) }
   0xa   : > { %v3043_v55 = vld [vmem:[%s4112_s5] sm:$0xff] (!%p338_p2)   ;;  %v3044_v56 = vld [vmem:[%s4112_s5 + $0x8] sm:$0xff] (!%p338_p2)  }
   0xb   : > { %520 = vmatpush1.bf16.msra.mxu0 (!%p338_p2), %v3032_v2 }
   0xc   : > { %521 = vmatprep.subr.bf16.mxu0 (!%p338_p2), %v3245_v1 }
   0xd   : > { %s4120_s18 = smov (!%p377_p3, %s2651_s18), 1 }
   0xe   : > { %s3017_s23 = smul.u32 48, %s4120_s18 }
   0xf   : > { %522 = vmatpush1.bf16.msra.mxu0 %v3033_v3  ;;  %s3018_s26 = smul.u32 24, %s4120_s18 }
  0x10   : > { %s3332_s28 = scalar_lea.vmem %s4107_s0, %s3017_s23  ;;  %523 = vmatprep.subr.bf16.mxu0 %v3245_v1 }
  0x11   : > { %v402_v5 = vld [vmem:[%s3332_s28 + $0x8] sm:$0xff]  ;;  %v404_v6 = vld [vmem:[%s3332_s28 + $0x18] sm:$0xff]  ;;  %v401_v16 = vld [vmem:[%s3332_s28] sm:$0xff]  ;;  %s386_s30 = scalar_lea.vmem %s4118_s11, %s3018_s26 }
  0x12   : > { %v408_v7 = vpack.c.bf16 %v404_v6, %v402_v5  ;;  %v403_v17 = vld [vmem:[%s3332_s28 + $0x10] sm:$0xff]  ;;  %v406_v18 = vld [vmem:[%s3332_s28 + $0x28] sm:$0xff]  ;;  %v405_v21 = vld [vmem:[%s3332_s28 + $0x20] sm:$0xff] }
  0x13   : > { %524 = vmatpush1.bf16.msra.mxu0 %v3034_v4  ;;  %v407_v19 = vpack.c.bf16 %v403_v17, %v401_v16  ;;  %v410_v20 = vpack.c.bf16 %v406_v18, %v406_v18  ;;  %v409_v22 = vpack.c.bf16 %v405_v21, %v405_v21  ;;  %v3405_v4 = vsub.s32 0, %v3402_v0  ;;  %v3410_v5 = vld [vmem:[%s4116_s9] sm:$0xff] }
  0x14   : > { %525 = vmatprep.subr.bf16.mxu0 %v3245_v1  ;;  %2670 = vmatprep.mubr.msk.bf16.mxu0 %vm510_vm0, %v408_v7 }
  0x17   : > { %526 = vmatpush1.bf16.msra.mxu0 %v3035_v8  ;;  %v610_v8 = vrot.slane %v3410_v5, %v3405_v4 }
  0x18   : > { %527 = vmatprep.subr.bf16.mxu0 %v3245_v1 }
  0x1b   : > { %528 = vmatpush1.bf16.msra.mxu0 %v3036_v9  ;;  %v3415_v9 = vsub.s32 1, %v3402_v0 }
  0x1c   : > { %529 = vmatprep.subr.bf16.mxu0 %v3245_v1 }
  0x1f   : > { %530 = vmatpush1.bf16.msra.mxu0 %v3037_v10 }
  0x20   : > { %531 = vmatprep.subr.bf16.mxu0 %v3245_v1 }
  0x23   : > { %532 = vmatpush1.bf16.msra.mxu0 %v3038_v11 }
  0x24   : > { %533 = vmatprep.subr.bf16.mxu0 %v3245_v1 }
  0x27   : > { %534 = vmatpush1.bf16.msra.mxu0 %v3039_v12 }
  0x28   : > { %535 = vmatprep.subr.bf16.mxu0 %v3245_v1 }
  0x2b   : > { %536 = vmatpush1.bf16.msra.mxu0 %v3040_v13  ;;  %v617_v13 = vrot.slane %v3410_v5, %v3415_v9 }
  0x2c   : > { %537 = vmatprep.subr.bf16.mxu0 %v3245_v1 }
  0x2f   : > { %538 = vmatpush1.bf16.msra.mxu0 %v3041_v14 }
  0x30   : > { %539 = vmatprep.subr.bf16.mxu0 %v3245_v1 }
  0x33   : > { %540 = vmatpush1.bf16.msra.mxu0 %v3042_v15 }
  0x34   : > { %2851 = vmatprep.subr.bf16.mxu0 %v3043_v55 }
  0x36   : > { %550 = vmatmul.mubr.bf16.vlgmr.msra.gmra.mrb[0].mxu0 %v407_v19 }
  0x37   : > { %2671 = vmatprep.mubr.msk.bf16.mxu0 %vm510_vm0, %v410_v20  ;;  %2852 = vmatpush3.bf16.msra.mxu0 %v3043_v55 }
  0x38   : > { %2853 = vmatprep.subr.bf16.mxu0 %v3044_v56 }
  0x3b   : > { %2854 = vmatpush3.bf16.msra.mxu0 %v3044_v56 }
  0x3e   : > { %558 = vmatmul.mubr.bf16.gmra.mrb[4].mxu0 %v409_v22 }
 0x109   : > { %v551_v24 = vpop.f32.mrb[0].mxu0 }
 0x10a   : > { %v3375_v26 = vadd.f32 %v551_v24, %v435_v23  ;;  %v553_v27 = vpop.f32.mrb[1].mxu0  ;;  %v629_v23 = vsub.s32 4, %v3402_v0 }
 0x10b   : > { %v554_v28 = vpop.f32.mrb[2].mxu0  ;;  %v3428_v27 = vld [vmem:[%s4110_s3 + $0x10] sm:$0xff] }
 0x10c   : > { %v3377_v29 = vadd.f32 %v554_v28, %v436_v25  ;;  %v556_v30 = vpop.f32.mrb[3].mxu0  ;;  %v567_v31 = vsel %vm566_vm1, %v3375_v26, 0.0  ;;  %v630_v24 = vrot.slane %v3410_v5, %v629_v23  ;;  %v3433_v28 = vld [vmem:[%s4110_s3 + $0x40] sm:$0xff] }
 0x10d   : > { %568 = vadd.xlane.f32.xlu0 %v567_v31 }
 0x10e   : > { %v570_v33 = vsel %vm566_vm1, %v3377_v29, 0.0 }
 0x111   : > { %v559_v34 = vpop.f32.mrb[4].mxu0  ;;  %571 = vadd.xlane.f32.xlu0 %v570_v33  ;;  %v3443_v33 = vld [vmem:[%s4110_s3 + $0x28] sm:$0xff] }
 0x112   : > { %v3386_v35 = vadd.f32 %v559_v34, %v437_v32  ;;  %v561_v36 = vpop.f32.mrb[5].mxu0  ;;  %v3438_v32 = vld [vmem:[%s4110_s3 + $0x18] sm:$0xff] }
 0x113   : > { %v562_v37 = vpop.f32.mrb[6].mxu0 }
 0x114   : > { %v563_v38 = vpop.f32.mrb[7].mxu0  ;;  %v573_v39 = vsel %vm566_vm1, %v3386_v35, 0.0  ;;  %v3448_v37 = vld [vmem:[%s4110_s3] sm:$0xff] }
 0x115   : > { %574 = vadd.xlane.f32.xlu1 %v573_v39  ;;  %v3453_v38 = vld [vmem:[%s4110_s3 + $0x30] sm:$0xff]  ;;  %v3458_v39 = vld [vmem:[%s4110_s3 + $0x48] sm:$0xff] }
 0x19a   : > { %v569_v40 = vpop.xlane.xlu0 %568 }
 0x19b   : > { %v577_v41 = vmul.f32 0.03125, %v569_v40 }
 0x19d   : > { %v580_v42 = vsub.f32 %v3375_v26, %v577_v41 }
 0x19e   : > { %v572_v43 = vpop.xlane.xlu0 %571 }
 0x19f   : > { %v578_v44 = vmul.f32 0.03125, %v572_v43  ;;  %v583_v45 = vmul.f32 %v580_v42, %v580_v42 }
 0x1a1   : > { %v581_v46 = vsub.f32 %v3377_v29, %v578_v44  ;;  %v586_v47 = vsel %vm566_vm1, %v583_v45, 0.0  ;;  %v3471_v44 = vld [vmem:[%s4110_s3 + $0x20] sm:$0xff] }
 0x1a2   : > { %v575_v48 = vpop.xlane.xlu1 %574  ;;  %587 = vadd.xlane.f32.xlu1 %v586_v47 }
 0x1a3   : > { %v579_v49 = vmul.f32 0.03125, %v575_v48  ;;  %v584_v50 = vmul.f32 %v581_v46, %v581_v46  ;;  %v3478_v48 = vld [vmem:[%s4110_s3 + $0x38] sm:$0xff] }
 0x1a5   : > { %v582_v51 = vsub.f32 %v3386_v35, %v579_v49  ;;  %v589_v52 = vsel %vm566_vm1, %v584_v50, 0.0  ;;  %v3483_v49 = vld [vmem:[%s4110_s3 + $0x50] sm:$0xff]  ;;  %v3488_v50 = vld [vmem:[%s4110_s3 + $0x58] sm:$0xff] }
 0x1a6   : > { %590 = vadd.xlane.f32.xlu0 %v589_v52 }
 0x1a7   : > { %v585_v53 = vmul.f32 %v582_v51, %v582_v51 }
 0x1a9   : > { %v592_v54 = vsel %vm566_vm1, %v585_v53, 0.0 }
 0x1aa   : > { %593 = vadd.xlane.f32.xlu1 %v592_v54 }
 0x22f   : > { %v588_v57 = vpop.xlane.xlu1 %587 }
 0x230   : > { %v595_v58 = vmul.f32 0.03125, %v588_v57 }
 0x232   : > { %v598_v59 = vadd.f32 1e-06, %v595_v58 }
 0x233   : > { %v591_v60 = vpop.xlane.xlu0 %590 }
 0x234   : > { %3073 = vrsqrt.f32 %v598_v59  ;;  %v596_v62 = vmul.f32 0.03125, %v591_v60 }
 0x236   : > { %v599_v63 = vadd.f32 1e-06, %v596_v62 }
 0x237   : > { %v594_v1 = vpop.xlane.xlu1 %593 }
 0x238   : > { %3075 = vrsqrt.f32 %v599_v63  ;;  %v597_v2 = vmul.f32 0.03125, %v594_v1 }
 0x23a   : > { %v600_v3 = vadd.f32 1e-06, %v597_v2 }
 0x23c   : > { %3077 = vrsqrt.f32 %v600_v3 }
 0x23e   : > { %v3074_v6 = vpop.eup %3073 }
 0x23f   : > { %v604_v7 = vmul.f32 %v3074_v6, %v580_v42  ;;  %v3465_v42 = vld [vmem:[%s4110_s3 + $0x8] sm:$0xff] }
 0x241   : > { %v611_v12 = vmul.f32 %v610_v8, %v604_v7 }
 0x242   : > { %v3076_v10 = vpop.eup %3075 }
 0x243   : > { %v605_v11 = vmul.f32 %v3076_v10, %v581_v46  ;;  %v618_v17 = vadd.f32 %v617_v13, %v611_v12  ;;  %v388_v12 = vld [vmem:[%s4111_s4] sm:$0xff] }
 0x245   : > { %v612_v14 = vmul.f32 %v610_v8, %v605_v11  ;;  %v3516_v11 = vsub.s32 3, %v3402_v0 }
 0x246   : > { %v3078_v15 = vpop.eup %3077 }
 0x247   : > { %v606_v16 = vmul.f32 %v3078_v15, %v582_v51  ;;  %v619_v18 = vadd.f32 %v617_v13, %v612_v14 }
 0x249   : > { %v613_v19 = vmul.f32 %v610_v8, %v606_v16  ;;  %v621_v20 = vpack.c.bf16 %v619_v18, %v618_v17 }
 0x24b   : > { %2855 = vmatprep.mubr.msk.bf16.mxu0 %vm566_vm1, %v621_v20  ;;  %v620_v21 = vadd.f32 %v617_v13, %v613_v19  ;;  %v3522_v13 = vrot.slane %v388_v12, %v3516_v11 }
 0x24d   : > { %v622_v22 = vpack.c.bf16 %v620_v21, %v620_v21 }
 0x24f   : > { %2856 = vmatmul.mubr.msk.bf16.vlgmr.msra.gmra.mrb[8].mxu0 %vm566_vm1, %v622_v22 }
 0x322   : > { %v2857_v25 = vpop.f32.mrb[8].mxu0 }
 0x323   : > { %v692_v30 = vadd.f32 %v2857_v25, %v630_v24  ;;  %v683_v31 = vpop.f32.mrb[9].mxu0 }
 0x324   : > { %v684_v34 = vadd.f32 %v683_v31, %v630_v24  ;;  %v2858_v36 = vpop.f32.mrb[10].mxu0 }
 0x325   : > { %v686_v40 = vpop.f32.mrb[11].mxu0  ;;  %v3460_v41 = vpack.c.bf16 %v692_v30, %v692_v30  ;;  %v699_v43 = vmul.f32 %v692_v30, %v3428_v27  ;;  %v705_v45 = vmul.f32 %v692_v30, %v3433_v28  ;;  %v702_v52 = vmul.f32 %v692_v30, %v3443_v33 }
 0x326   : > { %v687_v46 = vadd.f32 %v686_v40, %v630_v24  ;;  %v700_v47 = vmul.f32 %v684_v34, %v3438_v32  ;;  %v697_v51 = vmul.f32 %v684_v34, %v3448_v37  ;;  %v703_v53 = vmul.f32 %v684_v34, %v3453_v38 }
 0x327   : > { %725 = vrot.lane.b32.xlu1 %v3460_v41, %s3246_s14  ;;  %v706_v54 = vmul.f32 %v684_v34, %v3458_v39  ;;  %v708_v62 = vmul.f32 %v692_v30, %v3488_v50 }
 0x328   : > { %v3496_v55 = vpack.c.bf16 %v687_v46, %v684_v34  ;;  %v698_v56 = vmul.f32 %v687_v46, %v3465_v42  ;;  %v710_v57 = vpack.c.bf16 %v700_v47, %v699_v43  ;;  %v701_v58 = vmul.f32 %v687_v46, %v3471_v44 }
 0x329   : > { %v704_v59 = vmul.f32 %v687_v46, %v3478_v48  ;;  %v713_v60 = vpack.c.bf16 %v706_v54, %v705_v45  ;;  %v707_v61 = vmul.f32 %v687_v46, %v3483_v49 }
 0x32a   : > { %723 = vrot.lane.b32.xlu0 %v3496_v55, %s3246_s14  ;;  %v709_v63 = vpack.c.bf16 %v698_v56, %v697_v51  ;;  %v711_v1 = vpack.c.bf16 %v702_v52, %v701_v58 }
 0x32b   : > { %v712_v2 = vpack.c.bf16 %v704_v59, %v703_v53  ;;  %v714_v3 = vpack.c.bf16 %v708_v62, %v707_v61 }
 0x32c   : > { %2863 = vmatprep.mubr.msk.bf16.mxu1 %vm566_vm1, %v709_v63 }
 0x399   : > { %v726_v8 = vpop.permute.xlu1 %725 }
 0x39a   : > { %v749_v10 = vsel %vm566_vm1, %v726_v8, 0 }
 0x39c   : > { %v724_v6 = vpop.permute.xlu0 %723 }
 0x39d   : > { %3011 = vmatprep.subr.msk.bf16.mxu1 %vm566_vm1, %v724_v6  ;;  %v746_v7 = vsel %vm566_vm1, %v724_v6, 0 }
 0x39e   : > { %2860 = vmatpush3.bf16.xpose.msra.mxu1 %v746_v7 }
 0x39f   : > { %3012 = vmatprep.subr.msk.bf16.mxu1 %vm566_vm1, %v726_v8 }
 0x3a6   : > { %2862 = vmatpush3.bf16.xpose.msra.mxu1 %v749_v10 }
 0x3ad   : > { %2864 = vmatmul.mubr.msk.bf16.vlgmr.msra.gmra.mrb[0].mxu1 %vm566_vm1, %v710_v57 }
 0x3ae   : > { %2867 = vmatprep.mubr.msk.bf16.mxu1 %vm566_vm1, %v711_v1 }
 0x3b5   : > { %2868 = vmatmul.mubr.msk.bf16.gmra.mrb[4].mxu1 %vm566_vm1, %v712_v2 }
 0x3b6   : > { %2871 = vmatprep.mubr.msk.bf16.mxu1 %vm566_vm1, %v713_v60 }
 0x3bd   : > { %2872 = vmatmul.mubr.msk.bf16.gmra.mrb[8].mxu1 %vm566_vm1, %v714_v3 }
 0x480   : > { %v2865_v14 = vpop.f32.mrb[0].mxu1 }
 0x481   : > { %v785_v15 = vpop.f32.mrb[1].mxu1  ;;  %v794_v22 = vadd.f32 %v2865_v14, %v3522_v13 }
 0x482   : > { %v786_v16 = vadd.f32 %v785_v15, %v3522_v13  ;;  %v2866_v17 = vpop.f32.mrb[2].mxu1 }
 0x483   : > { %v788_v18 = vpop.f32.mrb[3].mxu1  ;;  %v797_v19 = vadd.f32 %v2866_v17, %v3522_v13  ;;  %v839_v40 = vsel %vm832_vm2, %v794_v22, -inf }
 0x484   : > { %v789_v20 = vadd.f32 %v788_v18, %v3522_v13  ;;  %v833_v21 = vsel %vm832_vm2, %v786_v16, -inf }
 0x485   : > { %834 = vmax.xlane.f32.xlu1 %v833_v21  ;;  %v842_v30 = vsel %vm832_vm2, %v797_v19, -inf }
 0x486   : > { %v836_v24 = vsel %vm832_vm2, %v789_v20, -inf }
 0x487   : > { %837 = vmax.xlane.f32.xlu0 %v836_v24 }
 0x488   : > { %v2869_v25 = vpop.f32.mrb[4].mxu1 }
 0x489   : > { %v801_v31 = vpop.f32.mrb[5].mxu1  ;;  %843 = vmax.xlane.f32.xlu1 %v842_v30  ;;  %v810_v46 = vadd.f32 %v2869_v25, %v3522_v13 }
 0x48a   : > { %v802_v34 = vadd.f32 %v801_v31, %v3522_v13  ;;  %v2870_v36 = vpop.f32.mrb[6].mxu1 }
 0x48b   : > { %v804_v43 = vpop.f32.mrb[7].mxu1  ;;  %840 = vmax.xlane.f32.xlu0 %v839_v40  ;;  %v813_v47 = vadd.f32 %v2870_v36, %v3522_v13  ;;  %v851_v58 = vsel %vm832_vm2, %v810_v46, -inf }
 0x48c   : > { %v805_v45 = vadd.f32 %v804_v43, %v3522_v13  ;;  %v845_v51 = vsel %vm832_vm2, %v802_v34, -inf }
 0x48d   : > { %v854_v59 = vsel %vm832_vm2, %v813_v47, -inf }
 0x48e   : > { %v848_v52 = vsel %vm832_vm2, %v805_v45, -inf }
 0x48f   : > { %846 = vmax.xlane.f32.xlu0 %v845_v51  ;;  %849 = vmax.xlane.f32.xlu1 %v848_v52 }
 0x490   : > { %v2873_v53 = vpop.f32.mrb[8].mxu1 }
 0x491   : > { %v817_v54 = vpop.f32.mrb[9].mxu1  ;;  %v826_v62 = vadd.f32 %v2873_v53, %v3522_v13 }
 0x492   : > { %v3539_v56 = vadd.f32 %v817_v54, %v3522_v13  ;;  %v2874_v57 = vpop.f32.mrb[10].mxu1 }
 0x493   : > { %v820_v60 = vpop.f32.mrb[11].mxu1  ;;  %852 = vmax.xlane.f32.xlu0 %v851_v58  ;;  %855 = vmax.xlane.f32.xlu1 %v854_v59  ;;  %v829_v63 = vadd.f32 %v2874_v57, %v3522_v13  ;;  %v863_v3 = vsel %vm832_vm2, %v826_v62, -inf }
 0x494   : > { %v3544_v61 = vadd.f32 %v820_v60, %v3522_v13  ;;  %v857_v1 = vsel %vm832_vm2, %v3539_v56, -inf }
 0x495   : > { %v866_v6 = vsel %vm832_vm2, %v829_v63, -inf }
 0x496   : > { %v860_v2 = vsel %vm832_vm2, %v3544_v61, -inf }
 0x497   : > { %858 = vmax.xlane.f32.xlu0 %v857_v1  ;;  %861 = vmax.xlane.f32.xlu1 %v860_v2 }
 0x49b   : > { %864 = vmax.xlane.f32.xlu0 %v863_v3  ;;  %867 = vmax.xlane.f32.xlu1 %v866_v6 }
 0x512   : > { %v835_v7 = vpop.xlane.xlu1 %834 }
 0x513   : > { %v869_v14 = vsub.f32 %v786_v16, %v835_v7 }
 0x514   : > { %v838_v8 = vpop.xlane.xlu0 %837 }
 0x515   : > { %v870_v10 = vsub.f32 %v789_v20, %v838_v8  ;;  %v881_v25 = vmul.f32 1.442695, %v869_v14 }
 0x516   : > { %v844_v12 = vpop.xlane.xlu1 %843 }
 0x517   : > { %v872_v15 = vsub.f32 %v797_v19, %v844_v12  ;;  %v883_v17 = vmul.f32 1.442695, %v870_v10 }
 0x518   : > { %v841_v18 = vpop.xlane.xlu0 %840 }
 0x519   : > { %v887_v21 = vmul.f32 1.442695, %v872_v15  ;;  %v871_v24 = vsub.f32 %v794_v22, %v841_v18 }
 0x51b   : > { %3079 = vpow2.f32 %v887_v21  ;;  %v885_v30 = vmul.f32 1.442695, %v871_v24 }
 0x51c   : > { %3081 = vpow2.f32 %v883_v17  ;;  %v847_v31 = vpop.xlane.xlu0 %846  ;;  %v850_v36 = vpop.xlane.xlu1 %849 }
 0x51d   : > { %3083 = vpow2.f32 %v885_v30  ;;  %v873_v40 = vsub.f32 %v802_v34, %v847_v31  ;;  %v874_v43 = vsub.f32 %v805_v45, %v850_v36 }
 0x51e   : > { %3085 = vpow2.f32 %v881_v25 }
 0x51f   : > { %v889_v16 = vmul.f32 1.442695, %v873_v40  ;;  %v891_v57 = vmul.f32 1.442695, %v874_v43 }
 0x520   : > { %v853_v51 = vpop.xlane.xlu0 %852  ;;  %v856_v52 = vpop.xlane.xlu1 %855 }
 0x521   : > { %v875_v20 = vsub.f32 %v810_v46, %v853_v51  ;;  %v876_v53 = vsub.f32 %v813_v47, %v856_v52 }
 0x523   : > { %v893_v19 = vmul.f32 1.442695, %v875_v20  ;;  %v895_v54 = vmul.f32 1.442695, %v876_v53 }
 0x524   : > { %v859_v58 = vpop.xlane.xlu0 %858  ;;  %v862_v22 = vpop.xlane.xlu1 %861 }
 0x525   : > { %v3554_v59 = vpop.eup %3079  ;;  %3087 = vpow2.f32 %v893_v19  ;;  %v877_v46 = vsub.f32 %v3539_v56, %v859_v58  ;;  %v878_v47 = vsub.f32 %v3544_v61, %v862_v22 }
 0x526   : > { %v3556_v60 = vpop.eup %3081  ;;  %3089 = vpow2.f32 %v895_v54  ;;  %v914_v34 = vsel %vm832_vm2, %v3554_v59, 0.0 }
 0x527   : > { %v3560_v45 = vpop.eup %3083  ;;  %3091 = vpow2.f32 %v889_v16  ;;  %915 = vadd.xlane.f32.xlu1 %v914_v34  ;;  %v908_v10 = vsel %vm832_vm2, %v3556_v60, 0.0  ;;  %v897_v12 = vmul.f32 1.442695, %v877_v46  ;;  %v899_v56 = vmul.f32 1.442695, %v878_v47 }
 0x528   : > { %3093 = vpow2.f32 %v891_v57  ;;  %v865_v1 = vpop.xlane.xlu0 %864  ;;  %v868_v2 = vpop.xlane.xlu1 %867  ;;  %v911_v3 = vsel %vm832_vm2, %v3560_v45, 0.0 }
 0x529   : > { %v3086_v6 = vpop.eup %3085  ;;  %v879_v7 = vsub.f32 %v826_v62, %v865_v1  ;;  %v880_v8 = vsub.f32 %v829_v63, %v868_v2  ;;  %912 = vadd.xlane.f32.xlu0 %v911_v3 }
 0x52a   : > { %v905_v17 = vsel %vm832_vm2, %v3086_v6, 0.0 }
 0x52b   : > { %v901_v14 = vmul.f32 1.442695, %v879_v7  ;;  %v903_v15 = vmul.f32 1.442695, %v880_v8  ;;  %909 = vadd.xlane.f32.xlu1 %v908_v10 }
 0x52d   : > { %3095 = vpow2.f32 %v901_v14  ;;  %906 = vadd.xlane.f32.xlu0 %v905_v17 }
 0x52e   : > { %3097 = vpow2.f32 %v903_v15 }
 0x52f   : > { %v3569_v61 = vpop.eup %3087  ;;  %3099 = vpow2.f32 %v897_v12 }
 0x530   : > { %v3571_v18 = vpop.eup %3089  ;;  %3101 = vpow2.f32 %v899_v56  ;;  %v923_v62 = vsel %vm832_vm2, %v3569_v61, 0.0 }
 0x531   : > { %v3575_v63 = vpop.eup %3091  ;;  %924 = vadd.xlane.f32.xlu0 %v923_v62  ;;  %v926_v21 = vsel %vm832_vm2, %v3571_v18, 0.0 }
 0x532   : > { %v3094_v24 = vpop.eup %3093  ;;  %927 = vadd.xlane.f32.xlu1 %v926_v21  ;;  %v917_v25 = vsel %vm832_vm2, %v3575_v63, 0.0 }
 0x533   : > { %v920_v30 = vsel %vm832_vm2, %v3094_v24, 0.0 }
 0x535   : > { %918 = vadd.xlane.f32.xlu0 %v917_v25 }
 0x536   : > { %921 = vadd.xlane.f32.xlu1 %v920_v30 }
 0x537   : > { %v3582_v31 = vpop.eup %3095 }
 0x538   : > { %v3584_v36 = vpop.eup %3097  ;;  %v935_v40 = vsel %vm832_vm2, %v3582_v31, 0.0 }
 0x539   : > { %v3588_v43 = vpop.eup %3099  ;;  %936 = vadd.xlane.f32.xlu0 %v935_v40  ;;  %v938_v51 = vsel %vm832_vm2, %v3584_v36, 0.0 }
 0x53a   : > { %v3592_v52 = vpop.eup %3101  ;;  %939 = vadd.xlane.f32.xlu1 %v938_v51  ;;  %v929_v20 = vsel %vm832_vm2, %v3588_v43, 0.0 }
 0x53b   : > { %v932_v53 = vsel %vm832_vm2, %v3592_v52, 0.0 }
 0x53d   : > { %930 = vadd.xlane.f32.xlu0 %v929_v20 }
 0x53e   : > { %933 = vadd.xlane.f32.xlu1 %v932_v53 }
 0x54f   : > { %973 = vrot.lane.b32.xlu1 %v3460_v41, %s3247_s16 }
 0x553   : > { %971 = vrot.lane.b32.xlu0 %v3496_v55, %s3247_s16 }
 0x5b4   : > { %v916_v16 = vpop.xlane.xlu1 %915 }
 0x5b6   : > { %v913_v19 = vpop.xlane.xlu0 %912 }
 0x5b8   : > { %v910_v54 = vpop.xlane.xlu1 %909 }
 0x5b9   : > { %3103 = vrcp.f32 %v910_v54 }
 0x5ba   : > { %v907_v57 = vpop.xlane.xlu0 %906 }
 0x5bb   : > { %3105 = vrcp.f32 %v907_v57 }
 0x5bc   : > { %3107 = vrcp.f32 %v913_v19 }
 0x5be   : > { %v925_v58 = vpop.xlane.xlu0 %924 }
 0x5bf   : > { %v928_v22 = vpop.xlane.xlu1 %927 }
 0x5c2   : > { %v919_v34 = vpop.xlane.xlu0 %918 }
 0x5c3   : > { %v3104_v46 = vpop.eup %3103  ;;  %v922_v47 = vpop.xlane.xlu1 %921  ;;  %3109 = vrcp.f32 %v919_v34 }
 0x5c4   : > { %3111 = vrcp.f32 %v922_v47  ;;  %v954_v55 = vmul.f32 %v3104_v46, %v3556_v60 }
 0x5c5   : > { %v3106_v1 = vpop.eup %3105  ;;  %3113 = vrcp.f32 %v916_v16 }
 0x5c6   : > { %v937_v41 = vpop.xlane.xlu0 %936  ;;  %v953_v2 = vmul.f32 %v3106_v1, %v3086_v6  ;;  %3115 = vrcp.f32 %v925_v58  ;;  %v3108_v12 = vpop.eup %3107 }
 0x5c7   : > { %v940_v3 = vpop.xlane.xlu1 %939  ;;  %3117 = vrcp.f32 %v928_v22  ;;  %v955_v60 = vmul.f32 %v3108_v12, %v3560_v45 }
 0x5c8   : > { %v965_v7 = vpack.c.bf16 %v954_v55, %v953_v2 }
 0x5ca   : > { %v931_v8 = vpop.xlane.xlu0 %930  ;;  %2879 = vmatprep.mubr.msk.bf16.mxu1 %vm832_vm2, %v965_v7 }
 0x5cb   : > { %v934_v10 = vpop.xlane.xlu1 %933  ;;  %3119 = vrcp.f32 %v931_v8 }
 0x5cc   : > { %3121 = vrcp.f32 %v934_v10 }
 0x5cd   : > { %v3110_v14 = vpop.eup %3109  ;;  %3123 = vrcp.f32 %v937_v41 }
 0x5ce   : > { %v972_v15 = vpop.permute.xlu0 %971  ;;  %v3112_v56 = vpop.eup %3111  ;;  %v957_v62 = vmul.f32 %v3110_v14, %v3575_v63  ;;  %3125 = vrcp.f32 %v940_v3 }
 0x5cf   : > { %2875 = vmatprep.subr.bf16.mxu1 %v972_v15  ;;  %v3114_v17 = vpop.eup %3113  ;;  %v974_v6 = vpop.permute.xlu1 %973  ;;  %v958_v21 = vmul.f32 %v3112_v56, %v3094_v24 }
 0x5d0   : > { %2876 = vmatpush3.bf16.msra.mxu1 %v972_v15  ;;  %v956_v25 = vmul.f32 %v3114_v17, %v3554_v59  ;;  %v996_v30 = vsel %vm994_vm3, %v974_v6, 0  ;;  %v3116_v40 = vpop.eup %3115 }
 0x5d1   : > { %3013 = vmatprep.subr.msk.bf16.mxu1 %vm994_vm3, %v974_v6  ;;  %v3118_v51 = vpop.eup %3117  ;;  %v967_v16 = vpack.c.bf16 %v958_v21, %v957_v62  ;;  %v959_v45 = vmul.f32 %v3116_v40, %v3569_v61  ;;  %v3045_v61 = vld [vmem:[%s4113_s6] sm:$0xff]  }
 0x5d2   : > { %v966_v20 = vpack.c.bf16 %v956_v25, %v955_v60  ;;  %v960_v63 = vmul.f32 %v3118_v51, %v3571_v18  ;;  %2891 = vmatprep.subr.bf16.mxu0 %v3045_v61  ;;  %v3046_v18 = vld [vmem:[%s4113_s6 + $0x8] sm:$0xff]  }
 0x5d3   : > { %2892 = vmatpush3.bf16.msra.mxu0 %v3045_v61 }
 0x5d4   : > { %2878 = vmatpush3.bf16.msra.mxu1 %v996_v30  ;;  %v968_v57 = vpack.c.bf16 %v960_v63, %v959_v45  ;;  %2893 = vmatprep.subr.bf16.mxu0 %v3046_v18 }
 0x5d5   : > { %v3120_v53 = vpop.eup %3119 }
 0x5d6   : > { %v3122_v19 = vpop.eup %3121  ;;  %v961_v59 = vmul.f32 %v3120_v53, %v3588_v43 }
 0x5d7   : > { %2880 = vmatmul.mubr.msk.bf16.vlgmr.msra.gmra.mrb[12].mxu1 %vm832_vm2, %v966_v20  ;;  %v962_v24 = vmul.f32 %v3122_v19, %v3592_v52  ;;  %v3124_v54 = vpop.eup %3123  ;;  %2894 = vmatpush3.bf16.msra.mxu0 %v3046_v18 }
 0x5d8   : > { %2883 = vmatprep.mubr.msk.bf16.mxu1 %vm832_vm2, %v967_v16  ;;  %v3126_v58 = vpop.eup %3125  ;;  %v963_v34 = vmul.f32 %v3124_v54, %v3582_v31 }
 0x5d9   : > { %v969_v22 = vpack.c.bf16 %v962_v24, %v961_v59  ;;  %v964_v46 = vmul.f32 %v3126_v58, %v3584_v36 }
 0x5db   : > { %v970_v47 = vpack.c.bf16 %v964_v46, %v963_v34 }
 0x5df   : > { %2884 = vmatmul.mubr.msk.bf16.gmra.mrb[16].mxu1 %vm832_vm2, %v968_v57 }
 0x5e0   : > { %2887 = vmatprep.mubr.msk.bf16.mxu1 %vm832_vm2, %v969_v22 }
 0x5e7   : > { %2888 = vmatmul.mubr.msk.bf16.gmra.mrb[20].mxu1 %vm832_vm2, %v970_v47 }
 0x6aa   : > { %v2881_v43 = vpop.f32.mrb[12].mxu1 }
 0x6ab   : > { %v1032_v52 = vpop.f32.mrb[13].mxu1 }
 0x6ac   : > { %v1079_v31 = vmul.f32 %v1032_v52, %v3448_v37  ;;  %v2882_v36 = vpop.f32.mrb[14].mxu1  ;;  %v1081_v37 = vmul.f32 %v2881_v43, %v3428_v27 }
 0x6ad   : > { %v1082_v1 = vmul.f32 %v2882_v36, %v3438_v32  ;;  %v1035_v41 = vpop.f32.mrb[15].mxu1 }
 0x6ae   : > { %v1080_v8 = vmul.f32 %v1035_v41, %v3465_v42 }
 0x6af   : > { %v1091_v2 = vadd.f32 %v1082_v1, %v1079_v31 }
 0x6b2   : > { %v2885_v55 = vpop.f32.mrb[16].mxu1 }
 0x6b3   : > { %v1085_v3 = vmul.f32 %v2885_v55, %v3453_v38  ;;  %v1048_v7 = vpop.f32.mrb[17].mxu1 }
 0x6b4   : > { %v1083_v10 = vmul.f32 %v1048_v7, %v3471_v44  ;;  %v2886_v12 = vpop.f32.mrb[18].mxu1  ;;  %v3048_v7 = vld [vmem:[%s4114_s7 + $0x8] sm:$0xff]  }
 0x6b5   : > { %v1094_v14 = vadd.f32 %v1091_v2, %v1085_v3  ;;  %v1086_v15 = vmul.f32 %v2886_v12, %v3478_v48  ;;  %v1051_v56 = vpop.f32.mrb[19].mxu1  ;;  %v3047_v3 = vld [vmem:[%s4114_s7] sm:$0xff]  }
 0x6b6   : > { %v1092_v17 = vadd.f32 %v1083_v10, %v1080_v8  ;;  %v1084_v32 = vmul.f32 %v1051_v56, %v3443_v33  ;;  %2899 = vmatprep.subr.bf16.mxu0 %v3047_v3 }
 0x6b8   : > { %v1095_v6 = vadd.f32 %v1092_v17, %v1086_v15  ;;  %v1093_v60 = vadd.f32 %v1084_v32, %v1081_v37 }
 0x6ba   : > { %v2889_v62 = vpop.f32.mrb[20].mxu1 }
 0x6bb   : > { %v1089_v38 = vmul.f32 %v2889_v62, %v3483_v49  ;;  %v1064_v21 = vpop.f32.mrb[21].mxu1  ;;  %v1177_v49 = vsub.s32 5, %v3402_v0 }
 0x6bc   : > { %v1087_v42 = vmul.f32 %v1064_v21, %v3433_v28  ;;  %v2890_v25 = vpop.f32.mrb[22].mxu1 }
 0x6bd   : > { %v1098_v44 = vadd.f32 %v1095_v6, %v1089_v38  ;;  %v1090_v30 = vmul.f32 %v2890_v25, %v3488_v50  ;;  %v1067_v40 = vpop.f32.mrb[23].mxu1  ;;  %v1178_v28 = vrot.slane %v3410_v5, %v1177_v49  ;;  %v3672_v6 = vsub.s32 2, %v3402_v0 }
 0x6be   : > { %v1096_v48 = vadd.f32 %v1093_v60, %v1087_v42  ;;  %v1088_v51 = vmul.f32 %v1067_v40, %v3458_v39 }
 0x6bf   : > { %v1224_v60 = vrot.slane %v3410_v5, %v3672_v6 }
 0x6c0   : > { %v1099_v27 = vadd.f32 %v1096_v48, %v1090_v30  ;;  %v1097_v20 = vadd.f32 %v1094_v14, %v1088_v51 }
 0x6c2   : > { %v1101_v53 = vpack.c.bf16 %v1099_v27, %v1099_v27  ;;  %v1100_v33 = vpack.c.bf16 %v1098_v44, %v1097_v20  ;;  %v1231_v44 = vrot.slane %v3410_v5, %v3516_v11 }
 0x6c4   : > { %2895 = vmatprep.mubr.msk.bf16.mxu0 %vm566_vm1, %v1100_v33 }
 0x6c5   : > { %2896 = vmatmul.mubr.msk.bf16.vlgmr.msra.gmra.mrb[12].mxu0 %vm566_vm1, %v1101_v53 }
 0x6c6   : > { %2900 = vmatpush3.bf16.msra.mxu0 %v3047_v3 }
 0x6c7   : > { %2901 = vmatprep.subr.bf16.mxu0 %v3048_v7 }
 0x6ca   : > { %2902 = vmatpush3.bf16.msra.mxu0 %v3048_v7 }
 0x798   : > { %v2897_v16 = vpop.f32.mrb[12].mxu0 }
 0x799   : > { %v1158_v50 = vpop.f32.mrb[13].mxu0  ;;  %v1174_v63 = vadd.f32 %v2897_v16, %v3386_v35 }
 0x79a   : > { %v1172_v19 = vadd.f32 %v1158_v50, %v3375_v26  ;;  %v2898_v45 = vpop.f32.mrb[14].mxu0  ;;  %v3050_v50 = vld [vmem:[%s4115_s8 + $0x8] sm:$0xff]  }
 0x79b   : > { %v1161_v39 = vpop.f32.mrb[15].mxu0  ;;  %v3653_v58 = vadd.f32 %v1178_v28, %v1174_v63  ;;  %v3052_v45 = vld [vmem:[%s4115_s8 + $0x18] sm:$0xff]   ;;  %v3054_v63 = vld [vmem:[%s4115_s8 + $0x28] sm:$0xff]  }
 0x79c   : > { %v3646_v59 = vadd.f32 %v1178_v28, %v1172_v19  ;;  %v1173_v24 = vadd.f32 %v1161_v39, %v3377_v29  ;;  %v3051_v19 = vld [vmem:[%s4115_s8 + $0x10] sm:$0xff]   ;;  %v3053_v39 = vld [vmem:[%s4115_s8 + $0x20] sm:$0xff]  }
 0x79d   : > { %v1188_v26 = vsel %vm566_vm1, %v3653_v58, 0.0 }
 0x79e   : > { %v3649_v54 = vadd.f32 %v1178_v28, %v1173_v24  ;;  %v1182_v57 = vsel %vm566_vm1, %v3646_v59, 0.0  ;;  %v3049_v28 = vld [vmem:[%s4115_s8] sm:$0xff]   ;;  %v3055_v24 = vld [vmem:[%s4115_s8 + $0x30] sm:$0xff]  }
 0x79f   : > { %1183 = vadd.xlane.f32.xlu1 %v1182_v57  ;;  %2907 = vmatprep.subr.bf16.mxu1 %v3049_v28  ;;  %v3056_v57 = vld [vmem:[%s4115_s8 + $0x38] sm:$0xff]  }
 0x7a0   : > { %v1185_v22 = vsel %vm566_vm1, %v3649_v54, 0.0  ;;  %2908 = vmatpush3.bf16.msra.mxu1 %v3049_v28 }
 0x7a1   : > { %1186 = vadd.xlane.f32.xlu0 %v1185_v22  ;;  %2909 = vmatprep.subr.bf16.mxu1 %v3050_v50  ;;  %v1243_v22 = vsub.s32 6, %v3402_v0 }
 0x7a4   : > { %2910 = vmatpush3.bf16.msra.mxu1 %v3050_v50 }
 0x7a5   : > { %1189 = vadd.xlane.f32.xlu0 %v1188_v26  ;;  %2911 = vmatprep.subr.bf16.mxu1 %v3051_v19  ;;  %v1244_v26 = vrot.slane %v3410_v5, %v1243_v22 }
 0x7a8   : > { %2912 = vmatpush3.bf16.msra.mxu1 %v3051_v19 }
 0x7a9   : > { %2913 = vmatprep.subr.bf16.mxu1 %v3052_v45 }
 0x7ac   : > { %2914 = vmatpush3.bf16.msra.mxu1 %v3052_v45 }
 0x7ad   : > { %2915 = vmatprep.subr.bf16.mxu1 %v3053_v39 }
 0x7b0   : > { %2916 = vmatpush3.bf16.msra.mxu1 %v3053_v39 }
 0x7b1   : > { %2917 = vmatprep.subr.bf16.mxu1 %v3054_v63 }
 0x7b4   : > { %2918 = vmatpush3.bf16.msra.mxu1 %v3054_v63 }
 0x7b5   : > { %2919 = vmatprep.subr.bf16.mxu1 %v3055_v24 }
 0x7b8   : > { %2920 = vmatpush3.bf16.msra.mxu1 %v3055_v24 }
 0x7b9   : > { %2921 = vmatprep.subr.bf16.mxu1 %v3056_v57 }
 0x7bc   : > { %2922 = vmatpush3.bf16.msra.mxu1 %v3056_v57 }
 0x82c   : > { %v1184_v35 = vpop.xlane.xlu1 %1183 }
 0x82d   : > { %v1191_v34 = vmul.f32 0.03125, %v1184_v35 }
 0x82e   : > { %v1187_v46 = vpop.xlane.xlu0 %1186 }
 0x82f   : > { %v1194_v29 = vsub.f32 %v3646_v59, %v1191_v34  ;;  %v1192_v47 = vmul.f32 0.03125, %v1187_v46 }
 0x831   : > { %v1195_v61 = vsub.f32 %v3649_v54, %v1192_v47  ;;  %v1197_v18 = vmul.f32 %v1194_v29, %v1194_v29 }
 0x832   : > { %v1190_v43 = vpop.xlane.xlu0 %1189 }
 0x833   : > { %v1193_v52 = vmul.f32 0.03125, %v1190_v43  ;;  %v1200_v31 = vsel %vm566_vm1, %v1197_v18, 0.0  ;;  %v1198_v36 = vmul.f32 %v1195_v61, %v1195_v61 }
 0x834   : > { %1201 = vadd.xlane.f32.xlu1 %v1200_v31 }
 0x835   : > { %v1196_v1 = vsub.f32 %v3653_v58, %v1193_v52  ;;  %v1203_v41 = vsel %vm566_vm1, %v1198_v36, 0.0 }
 0x836   : > { %1204 = vadd.xlane.f32.xlu0 %v1203_v41 }
 0x837   : > { %v1199_v2 = vmul.f32 %v1196_v1, %v1196_v1 }
 0x839   : > { %v1206_v55 = vsel %vm566_vm1, %v1199_v2, 0.0 }
 0x83a   : > { %1207 = vadd.xlane.f32.xlu1 %v1206_v55 }
 0x8c1   : > { %v1202_v8 = vpop.xlane.xlu1 %1201 }
 0x8c2   : > { %v1209_v10 = vmul.f32 0.03125, %v1202_v8 }
 0x8c3   : > { %v1205_v12 = vpop.xlane.xlu0 %1204 }
 0x8c4   : > { %v1212_v14 = vadd.f32 1e-06, %v1209_v10  ;;  %v1210_v15 = vmul.f32 0.03125, %v1205_v12 }
 0x8c6   : > { %3127 = vrsqrt.f32 %v1212_v14  ;;  %v1213_v56 = vadd.f32 1e-06, %v1210_v15 }
 0x8c7   : > { %v1208_v37 = vpop.xlane.xlu1 %1207 }
 0x8c8   : > { %3129 = vrsqrt.f32 %v1213_v56  ;;  %v1211_v17 = vmul.f32 0.03125, %v1208_v37 }
 0x8ca   : > { %v1214_v32 = vadd.f32 1e-06, %v1211_v17 }
 0x8cc   : > { %3131 = vrsqrt.f32 %v1214_v32 }
 0x8d0   : > { %v3128_v62 = vpop.eup %3127 }
 0x8d1   : > { %v1218_v38 = vmul.f32 %v3128_v62, %v1194_v29 }
 0x8d2   : > { %v3130_v21 = vpop.eup %3129 }
 0x8d3   : > { %v1219_v42 = vmul.f32 %v3130_v21, %v1195_v61  ;;  %v1225_v25 = vmul.f32 %v1224_v60, %v1218_v38 }
 0x8d5   : > { %v1226_v30 = vmul.f32 %v1224_v60, %v1219_v42  ;;  %v1232_v51 = vadd.f32 %v1231_v44, %v1225_v25 }
 0x8d6   : > { %v3132_v40 = vpop.eup %3131 }
 0x8d7   : > { %v1220_v48 = vmul.f32 %v3132_v40, %v1196_v1  ;;  %v1233_v27 = vadd.f32 %v1231_v44, %v1226_v30 }
 0x8d9   : > { %v1235_v20 = vpack.c.bf16 %v1233_v27, %v1232_v51  ;;  %v1227_v53 = vmul.f32 %v1224_v60, %v1220_v48 }
 0x8db   : > { %2903 = vmatprep.mubr.msk.bf16.mxu0 %vm566_vm1, %v1235_v20  ;;  %v1234_v33 = vadd.f32 %v1231_v44, %v1227_v53 }
 0x8dd   : > { %v1236_v16 = vpack.c.bf16 %v1234_v33, %v1234_v33 }
 0x8df   : > { %2904 = vmatmul.mubr.msk.bf16.vlgmr.msra.gmra.mrb[16].mxu0 %vm566_vm1, %v1236_v16 }
 0x9b2   : > { %v2905_v35 = vpop.f32.mrb[16].mxu0 }
 0x9b3   : > { %v3708_v34 = vadd.f32 %v2905_v35, %v1244_v26  ;;  %v1297_v46 = vpop.f32.mrb[17].mxu0 }
 0x9b4   : > { %v3710_v29 = vadd.f32 %v1297_v46, %v1244_v26  ;;  %v2906_v47 = vpop.f32.mrb[18].mxu0 }
 0x9b5   : > { %v3713_v61 = vmul.f32 0.70710677, %v3708_v34  ;;  %v1300_v18 = vpop.f32.mrb[19].mxu0 }
 0x9b6   : > { %v3716_v43 = vmul.f32 0.70710677, %v3710_v29  ;;  %v3718_v52 = vadd.f32 %v1300_v18, %v1244_v26 }
 0x9b7   : > { %v1325_v31 = vand.u32 2147483647, %v3713_v61  ;;  %vm1319_vm4 = vcmp.ge.f32.partialorder %v3713_v61, 0.0 }
 0x9b8   : > { %v1323_v5 = vand.u32 2147483647, %v3716_v43  ;;  %v3723_v1 = vmul.f32 0.70710677, %v3718_v52  ;;  %vm1317_vm5 = vcmp.ge.f32.partialorder %v3716_v43, 0.0 }
 0x9b9   : > { %v1328_v36 = vmul.f32 0.3275911, %v1325_v31  ;;  %v1367_v10 = vsub.f32 0.0, %v1325_v31 }
 0x9ba   : > { %v1326_v41 = vmul.f32 0.3275911, %v1323_v5  ;;  %v1324_v55 = vand.u32 2147483647, %v3723_v1  ;;  %v1365_v12 = vsub.f32 0.0, %v1323_v5  ;;  %vm1318_vm6 = vcmp.ge.f32.partialorder %v3723_v1, 0.0 }
 0x9bb   : > { %v1331_v2 = vadd.f32 1.0, %v1328_v36  ;;  %v1370_v15 = vmul.f32 %v1367_v10, %v1325_v31 }
 0x9bc   : > { %v1329_v3 = vadd.f32 1.0, %v1326_v41  ;;  %v1327_v7 = vmul.f32 0.3275911, %v1324_v55  ;;  %v1366_v56 = vsub.f32 0.0, %v1324_v55  ;;  %v1368_v32 = vmul.f32 %v1365_v12, %v1323_v5 }
 0x9bd   : > { %3133 = vrcp.f32 %v1331_v2  ;;  %v1375_v21 = vmul.f32 1.442695, %v1370_v15 }
 0x9be   : > { %3135 = vrcp.f32 %v1329_v3  ;;  %v1330_v8 = vadd.f32 1.0, %v1327_v7  ;;  %v1369_v25 = vmul.f32 %v1366_v56, %v1324_v55  ;;  %v1371_v30 = vmul.f32 1.442695, %v1368_v32 }
 0x9c0   : > { %3137 = vrcp.f32 %v1330_v8  ;;  %v1373_v53 = vmul.f32 1.442695, %v1369_v25  ;;  %v3248_v8 = vmov -1.0  }
 0x9c1   : > { %3139 = vpow2.f32 %v1375_v21  ;;  %v1322_v10 = vsel %vm1319_vm4, 1.0, %v3248_v8  ;;  %v1321_v32 = vsel %vm1318_vm6, 1.0, %v3248_v8  ;;  %v1312_v21 = vmul.f32 0.5, %v3718_v52 }
 0x9c2   : > { %3141 = vpow2.f32 %v1371_v30 }
 0x9c3   : > { %3143 = vpow2.f32 %v1373_v53 }
 0x9c7   : > { %v3134_v14 = vpop.eup %3133 }
 0x9c8   : > { %v3136_v37 = vpop.eup %3135  ;;  %v1340_v17 = vmul.f32 1.0614054, %v3134_v14 }
 0x9c9   : > { %v1338_v60 = vmul.f32 1.0614054, %v3136_v37 }
 0x9ca   : > { %v1343_v62 = vadd.f32 -1.4531521, %v1340_v17  ;;  %v3138_v38 = vpop.eup %3137 }
 0x9cb   : > { %v1341_v42 = vadd.f32 -1.4531521, %v1338_v60  ;;  %v1339_v40 = vmul.f32 1.0614054, %v3138_v38  ;;  %v3140_v18 = vpop.eup %3139 }
 0x9cc   : > { %v1346_v44 = vmul.f32 %v3134_v14, %v1343_v62  ;;  %v3142_v5 = vpop.eup %3141  ;;  %v1313_v62 = vmul.f32 0.5, %v3708_v34 }
 0x9cd   : > { %v1344_v48 = vmul.f32 %v3136_v37, %v1341_v42  ;;  %v1342_v27 = vadd.f32 -1.4531521, %v1339_v40  ;;  %v3144_v7 = vpop.eup %3143 }
 0x9ce   : > { %v1349_v51 = vadd.f32 1.4214138, %v1346_v44 }
 0x9cf   : > { %v1347_v20 = vadd.f32 1.4214138, %v1344_v48  ;;  %v1345_v16 = vmul.f32 %v3138_v38, %v1342_v27  ;;  %v1511_v48 = vsub.s32 7, %v3402_v0  ;;  %v3223_v27 = vld [vmem:[%s4116_s9] sm:$0xff] }
 0x9d0   : > { %v1352_v33 = vmul.f32 %v3134_v14, %v1349_v51 }
 0x9d1   : > { %v1350_v28 = vmul.f32 %v3136_v37, %v1347_v20  ;;  %v1348_v19 = vadd.f32 1.4214138, %v1345_v16  ;;  %v1512_v34 = vrot.slane %v3223_v27, %v1511_v48 }
 0x9d2   : > { %v1355_v50 = vadd.f32 -0.28449672, %v1352_v33 }
 0x9d3   : > { %v1353_v45 = vadd.f32 -0.28449672, %v1350_v28  ;;  %v1351_v63 = vmul.f32 %v3138_v38, %v1348_v19 }
 0x9d4   : > { %v1358_v39 = vmul.f32 %v3134_v14, %v1355_v50 }
 0x9d5   : > { %v1356_v24 = vmul.f32 %v3136_v37, %v1353_v45  ;;  %v1354_v26 = vadd.f32 -0.28449672, %v1351_v63 }
 0x9d6   : > { %v1361_v57 = vadd.f32 0.2548296, %v1358_v39 }
 0x9d7   : > { %v1359_v35 = vadd.f32 0.2548296, %v1356_v24  ;;  %v1357_v47 = vmul.f32 %v3138_v38, %v1354_v26 }
 0x9d8   : > { %v1364_v46 = vmul.f32 %v3134_v14, %v1361_v57  ;;  %v1320_v14 = vsel %vm1317_vm5, 1.0, %v3248_v8 }
 0x9d9   : > { %v1362_v31 = vmul.f32 %v3136_v37, %v1359_v35  ;;  %v1360_v41 = vadd.f32 0.2548296, %v1357_v47 }
 0x9da   : > { %v1379_v36 = vmul.f32 %v3140_v18, %v1364_v46 }
 0x9db   : > { %v1377_v2 = vmul.f32 %v3142_v5, %v1362_v31  ;;  %v1363_v3 = vmul.f32 %v3138_v38, %v1360_v41  ;;  %v1311_v38 = vmul.f32 0.5, %v3710_v29 }
 0x9dc   : > { %v1382_v55 = vsub.f32 1.0, %v1379_v36 }
 0x9dd   : > { %v1380_v12 = vsub.f32 1.0, %v1377_v2  ;;  %v1378_v56 = vmul.f32 %v3144_v7, %v1363_v3  ;;  %v3058_v3 = vld [vmem:[%s4112_s5 + $0x18] sm:$0xff]  }
 0x9de   : > { %v1385_v15 = vmul.f32 %v1382_v55, %v1322_v10  ;;  %v3057_v55 = vld [vmem:[%s4112_s5 + $0x10] sm:$0xff]  }
 0x9df   : > { %v1383_v37 = vmul.f32 %v1380_v12, %v1320_v14  ;;  %v1381_v61 = vsub.f32 1.0, %v1378_v56  ;;  %2927 = vmatprep.subr.bf16.mxu0 %v3057_v55 }
 0x9e0   : > { %v1388_v17 = vadd.f32 1.0, %v1385_v15  ;;  %2928 = vmatpush3.bf16.msra.mxu0 %v3057_v55 }
 0x9e1   : > { %v1386_v43 = vadd.f32 1.0, %v1383_v37  ;;  %v1384_v60 = vmul.f32 %v1381_v61, %v1321_v32  ;;  %2929 = vmatprep.subr.bf16.mxu0 %v3058_v3  ;;  %v3771_v32 = vld [vmem:[%s4116_s9 + $0x8] sm:$0xff] }
 0x9e2   : > { %v1391_v25 = vmul.f32 %v1388_v17, %v1313_v62 }
 0x9e3   : > { %v1387_v42 = vadd.f32 1.0, %v1384_v60  ;;  %v1389_v44 = vmul.f32 %v1386_v43, %v1311_v38  ;;  %v1560_v43 = vrot.slane %v3771_v32, %v3405_v4 }
 0x9e4   : > { %v1393_v1 = vpack.c.bf16 %v1391_v25, %v1391_v25  ;;  %2930 = vmatpush3.bf16.msra.mxu0 %v3058_v3  ;;  %v1567_v25 = vrot.slane %v3771_v32, %v3415_v9  ;;  %v3833_v3 = vld [vmem:[%s4110_s3 + $0x8] sm:$0xff] }
 0x9e5   : > { %v1390_v30 = vmul.f32 %v1387_v42, %v1312_v21 }
 0x9e7   : > { %v1392_v40 = vpack.c.bf16 %v1390_v30, %v1389_v44 }
 0x9e9   : > { %2923 = vmatprep.mubr.bf16.mxu1 %v1392_v40 }
 0x9ea   : > { %2924 = vmatmul.mubr.bf16.vlgmr.msra.gmra.mrb[24].mxu1 %v1393_v1 }
 0xabd   : > { %v2925_v51 = vpop.f32.mrb[24].mxu1 }
 0xabe   : > { %v1492_v29 = vpop.f32.mrb[25].mxu1  ;;  %v1508_v52 = vadd.f32 %v2925_v51, %v3653_v58 }
 0xabf   : > { %v1506_v20 = vadd.f32 %v1492_v29, %v3646_v59  ;;  %v2926_v53 = vpop.f32.mrb[26].mxu1 }
 0xac0   : > { %v1495_v33 = vpop.f32.mrb[27].mxu1  ;;  %v3746_v50 = vadd.f32 %v1512_v34, %v1508_v52 }
 0xac1   : > { %v3743_v16 = vadd.f32 %v1512_v34, %v1506_v20  ;;  %v1507_v28 = vadd.f32 %v1495_v33, %v3649_v54  ;;  %v1581_v20 = vrot.slane %v3771_v32, %v629_v23 }
 0xac2   : > { %v1524_v59 = vsel %vm566_vm1, %v3746_v50, 0.0 }
 0xac3   : > { %v3748_v19 = vadd.f32 %v1512_v34, %v1507_v28  ;;  %v1518_v45 = vsel %vm566_vm1, %v3743_v16, 0.0 }
 0xac4   : > { %1519 = vadd.xlane.f32.xlu0 %v1518_v45 }
 0xac5   : > { %v1521_v39 = vsel %vm566_vm1, %v3748_v19, 0.0 }
 0xac6   : > { %1522 = vadd.xlane.f32.xlu1 %v1521_v39 }
 0xac8   : > { %1525 = vadd.xlane.f32.xlu0 %v1524_v59  ;;  %v3785_v59 = vld [vmem:[%s4110_s3 + $0x10] sm:$0xff] }
 0xb51   : > { %v1520_v58 = vpop.xlane.xlu0 %1519 }
 0xb52   : > { %v1527_v63 = vmul.f32 0.03125, %v1520_v58 }
 0xb53   : > { %v1523_v24 = vpop.xlane.xlu1 %1522 }
 0xb54   : > { %v1530_v54 = vsub.f32 %v3743_v16, %v1527_v63  ;;  %v1528_v57 = vmul.f32 0.03125, %v1523_v24 }
 0xb55   : > { %v1526_v26 = vpop.xlane.xlu0 %1525 }
 0xb56   : > { %v1531_v35 = vsub.f32 %v3748_v19, %v1528_v57  ;;  %v1529_v46 = vmul.f32 0.03125, %v1526_v26  ;;  %v1533_v47 = vmul.f32 %v1530_v54, %v1530_v54  ;;  %v3799_v57 = vld [vmem:[%s4110_s3 + $0x18] sm:$0xff] }
 0xb58   : > { %v1532_v18 = vsub.f32 %v3746_v50, %v1529_v46  ;;  %v1536_v31 = vsel %vm566_vm1, %v1533_v47, 0.0  ;;  %v1534_v5 = vmul.f32 %v1531_v35, %v1531_v35  ;;  %v3807_v46 = vld [vmem:[%s4110_s3] sm:$0xff] }
 0xb59   : > { %1537 = vadd.xlane.f32.xlu1 %v1536_v31 }
 0xb5a   : > { %v1539_v36 = vsel %vm566_vm1, %v1534_v5, 0.0  ;;  %v1535_v41 = vmul.f32 %v1532_v18, %v1532_v18  ;;  %v3819_v5 = vld [vmem:[%s4110_s3 + $0x30] sm:$0xff] }
 0xb5b   : > { %1540 = vadd.xlane.f32.xlu0 %v1539_v36 }
 0xb5c   : > { %v1542_v2 = vsel %vm566_vm1, %v1535_v41, 0.0  ;;  %v3825_v41 = vld [vmem:[%s4110_s3 + $0x48] sm:$0xff] }
 0xb5d   : > { %1543 = vadd.xlane.f32.xlu1 %v1542_v2 }
 0xbe6   : > { %v1538_v7 = vpop.xlane.xlu1 %1537 }
 0xbe7   : > { %v1545_v10 = vmul.f32 0.03125, %v1538_v7 }
 0xbe8   : > { %v1541_v12 = vpop.xlane.xlu0 %1540 }
 0xbe9   : > { %v1548_v15 = vadd.f32 1e-06, %v1545_v10  ;;  %v1546_v14 = vmul.f32 0.03125, %v1541_v12  ;;  %v3839_v12 = vld [vmem:[%s4110_s3 + $0x20] sm:$0xff] }
 0xbea   : > { %v1544_v56 = vpop.xlane.xlu1 %1543 }
 0xbeb   : > { %3145 = vrsqrt.f32 %v1548_v15  ;;  %v1549_v37 = vadd.f32 1e-06, %v1546_v14  ;;  %v1547_v61 = vmul.f32 0.03125, %v1544_v56  ;;  %v3845_v14 = vld [vmem:[%s4110_s3 + $0x38] sm:$0xff] }
 0xbed   : > { %3147 = vrsqrt.f32 %v1549_v37  ;;  %v1550_v17 = vadd.f32 1e-06, %v1547_v61  ;;  %v3851_v61 = vld [vmem:[%s4110_s3 + $0x50] sm:$0xff] }
 0xbef   : > { %3149 = vrsqrt.f32 %v1550_v17 }
 0xbf5   : > { %v3146_v60 = vpop.eup %3145 }
 0xbf6   : > { %v1554_v62 = vmul.f32 %v3146_v60, %v1530_v54  ;;  %v3793_v54 = vld [vmem:[%s4110_s3 + $0x40] sm:$0xff] }
 0xbf7   : > { %v3148_v38 = vpop.eup %3147 }
 0xbf8   : > { %v1555_v21 = vmul.f32 %v3148_v38, %v1531_v35  ;;  %v1561_v42 = vmul.f32 %v1560_v43, %v1554_v62 }
 0xbf9   : > { %v3150_v44 = vpop.eup %3149 }
 0xbfa   : > { %v1556_v30 = vmul.f32 %v3150_v44, %v1532_v18  ;;  %v1562_v40 = vmul.f32 %v1560_v43, %v1555_v21  ;;  %v1568_v1 = vadd.f32 %v1567_v25, %v1561_v42  ;;  %v3813_v18 = vld [vmem:[%s4110_s3 + $0x28] sm:$0xff] }
 0xbfc   : > { %v1569_v51 = vadd.f32 %v1567_v25, %v1562_v40  ;;  %v1563_v27 = vmul.f32 %v1560_v43, %v1556_v30  ;;  %v3857_v43 = vld [vmem:[%s4110_s3 + $0x58] sm:$0xff] }
 0xbfe   : > { %v1571_v34 = vpack.c.bf16 %v1569_v51, %v1568_v1  ;;  %v1570_v29 = vadd.f32 %v1567_v25, %v1563_v27 }
 0xc00   : > { %2931 = vmatprep.mubr.msk.bf16.mxu0 %vm566_vm1, %v1571_v34  ;;  %v1572_v52 = vpack.c.bf16 %v1570_v29, %v1570_v29 }
 0xc02   : > { %2932 = vmatmul.mubr.msk.bf16.vlgmr.msra.gmra.mrb[20].mxu0 %vm566_vm1, %v1572_v52 }
 0xcd5   : > { %v2933_v53 = vpop.f32.mrb[20].mxu0 }
 0xcd6   : > { %v1643_v33 = vadd.f32 %v2933_v53, %v1581_v20  ;;  %v1634_v28 = vpop.f32.mrb[21].mxu0 }
 0xcd7   : > { %v1635_v45 = vadd.f32 %v1634_v28, %v1581_v20  ;;  %v2934_v39 = vpop.f32.mrb[22].mxu0 }
 0xcd8   : > { %v1650_v58 = vmul.f32 %v3785_v59, %v1643_v33  ;;  %v1637_v63 = vpop.f32.mrb[23].mxu0  ;;  %v3788_v24 = vpack.c.bf16 %v1643_v33, %v1643_v33  ;;  %v1656_v23 = vmul.f32 %v3793_v54, %v1643_v33  ;;  %v1653_v31 = vmul.f32 %v3813_v18, %v1643_v33 }
 0xcd9   : > { %v1651_v26 = vmul.f32 %v3799_v57, %v1635_v45  ;;  %v1638_v35 = vadd.f32 %v1637_v63, %v1581_v20  ;;  %v1648_v47 = vmul.f32 %v3807_v46, %v1635_v45  ;;  %v1654_v36 = vmul.f32 %v3819_v5, %v1635_v45 }
 0xcda   : > { %1672 = vrot.lane.b32.xlu1 %v3788_v24, %s3246_s14  ;;  %v1657_v2 = vmul.f32 %v3825_v41, %v1635_v45  ;;  %v1659_v60 = vmul.f32 %v3857_v43, %v1643_v33 }
 0xcdb   : > { %v3828_v55 = vpack.c.bf16 %v1638_v35, %v1635_v45  ;;  %v1649_v7 = vmul.f32 %v3833_v3, %v1638_v35  ;;  %v1661_v10 = vpack.c.bf16 %v1651_v26, %v1650_v58  ;;  %v1652_v15 = vmul.f32 %v3839_v12, %v1638_v35 }
 0xcdc   : > { %v1655_v56 = vmul.f32 %v3845_v14, %v1638_v35  ;;  %v1664_v37 = vpack.c.bf16 %v1657_v2, %v1656_v23  ;;  %v1658_v17 = vmul.f32 %v3851_v61, %v1638_v35 }
 0xcdd   : > { %1670 = vrot.lane.b32.xlu0 %v3828_v55, %s3246_s14  ;;  %v1660_v62 = vpack.c.bf16 %v1649_v7, %v1648_v47  ;;  %v1662_v38 = vpack.c.bf16 %v1653_v31, %v1652_v15 }
 0xcde   : > { %v1663_v21 = vpack.c.bf16 %v1655_v56, %v1654_v36  ;;  %v1665_v42 = vpack.c.bf16 %v1659_v60, %v1658_v17 }
 0xcdf   : > { %2939 = vmatprep.mubr.msk.bf16.mxu0 %vm566_vm1, %v1660_v62 }
 0xd4c   : > { %v1673_v30 = vpop.permute.xlu1 %1672 }
 0xd4d   : > { %v1696_v40 = vsel %vm566_vm1, %v1673_v30, 0 }
 0xd4f   : > { %v1671_v25 = vpop.permute.xlu0 %1670 }
 0xd50   : > { %v1693_v44 = vsel %vm566_vm1, %v1671_v25, 0  ;;  %3014 = vmatprep.subr.msk.bf16.mxu0 %vm566_vm1, %v1671_v25 }
 0xd51   : > { %2936 = vmatpush3.bf16.xpose.msra.mxu0 %v1693_v44 }
 0xd52   : > { %3015 = vmatprep.subr.msk.bf16.mxu0 %vm566_vm1, %v1673_v30 }
 0xd59   : > { %2938 = vmatpush3.bf16.xpose.msra.mxu0 %v1696_v40 }
 0xd60   : > { %2940 = vmatmul.mubr.msk.bf16.vlgmr.msra.gmra.mrb[24].mxu0 %vm566_vm1, %v1661_v10 }
 0xd61   : > { %2943 = vmatprep.mubr.msk.bf16.mxu0 %vm566_vm1, %v1662_v38 }
 0xd68   : > { %2944 = vmatmul.mubr.msk.bf16.gmra.mrb[28].mxu0 %vm566_vm1, %v1663_v21 }
 0xd69   : > { %2947 = vmatprep.mubr.msk.bf16.mxu0 %vm566_vm1, %v1664_v37 }
 0xd70   : > { %2948 = vmatmul.mubr.msk.bf16.gmra.mrb[32].mxu0 %vm566_vm1, %v1665_v42 }
 0xe33   : > { %v2941_v1 = vpop.f32.mrb[24].mxu0 }
 0xe34   : > { %v1732_v51 = vpop.f32.mrb[25].mxu0  ;;  %v1741_v33 = vadd.f32 %v2941_v1, %v3522_v13 }
 0xe35   : > { %v1733_v27 = vadd.f32 %v1732_v51, %v3522_v13  ;;  %v2942_v34 = vpop.f32.mrb[26].mxu0 }
 0xe36   : > { %v1735_v29 = vpop.f32.mrb[27].mxu0  ;;  %v1744_v52 = vadd.f32 %v2942_v34, %v3522_v13  ;;  %v1785_v26 = vsel %vm832_vm2, %v1741_v33, -inf }
 0xe37   : > { %v1736_v20 = vadd.f32 %v1735_v29, %v3522_v13  ;;  %v1779_v53 = vsel %vm832_vm2, %v1733_v27, -inf }
 0xe38   : > { %1780 = vmax.xlane.f32.xlu1 %v1779_v53  ;;  %v1788_v39 = vsel %vm832_vm2, %v1744_v52, -inf }
 0xe39   : > { %v1782_v28 = vsel %vm832_vm2, %v1736_v20, -inf }
 0xe3a   : > { %1783 = vmax.xlane.f32.xlu0 %v1782_v28 }
 0xe3b   : > { %v2945_v45 = vpop.f32.mrb[28].mxu0 }
 0xe3c   : > { %v1748_v58 = vpop.f32.mrb[29].mxu0  ;;  %1789 = vmax.xlane.f32.xlu1 %v1788_v39  ;;  %v1757_v31 = vadd.f32 %v2945_v45, %v3522_v13 }
 0xe3d   : > { %v1749_v63 = vadd.f32 %v1748_v58, %v3522_v13  ;;  %v2946_v23 = vpop.f32.mrb[30].mxu0 }
 0xe3e   : > { %v1751_v35 = vpop.f32.mrb[31].mxu0  ;;  %1786 = vmax.xlane.f32.xlu0 %v1785_v26  ;;  %v1760_v36 = vadd.f32 %v2946_v23, %v3522_v13  ;;  %v1797_v17 = vsel %vm832_vm2, %v1757_v31, -inf }
 0xe3f   : > { %v1752_v47 = vadd.f32 %v1751_v35, %v3522_v13  ;;  %v1791_v2 = vsel %vm832_vm2, %v1749_v63, -inf }
 0xe40   : > { %v1800_v60 = vsel %vm832_vm2, %v1760_v36, -inf }
 0xe41   : > { %v1794_v7 = vsel %vm832_vm2, %v1752_v47, -inf }
 0xe42   : > { %1792 = vmax.xlane.f32.xlu0 %v1791_v2  ;;  %1795 = vmax.xlane.f32.xlu1 %v1794_v7 }
 0xe43   : > { %v2949_v10 = vpop.f32.mrb[32].mxu0 }
 0xe44   : > { %v1764_v15 = vpop.f32.mrb[33].mxu0  ;;  %v1773_v21 = vadd.f32 %v2949_v10, %v3522_v13 }
 0xe45   : > { %v3887_v56 = vadd.f32 %v1764_v15, %v3522_v13  ;;  %v2950_v37 = vpop.f32.mrb[34].mxu0 }
 0xe46   : > { %v1767_v62 = vpop.f32.mrb[35].mxu0  ;;  %1798 = vmax.xlane.f32.xlu0 %v1797_v17  ;;  %1801 = vmax.xlane.f32.xlu1 %v1800_v60  ;;  %v1776_v42 = vadd.f32 %v2950_v37, %v3522_v13  ;;  %v1809_v30 = vsel %vm832_vm2, %v1773_v21, -inf }
 0xe47   : > { %v3892_v38 = vadd.f32 %v1767_v62, %v3522_v13  ;;  %v1803_v25 = vsel %vm832_vm2, %v3887_v56, -inf }
 0xe48   : > { %v1812_v40 = vsel %vm832_vm2, %v1776_v42, -inf }
 0xe49   : > { %v1806_v44 = vsel %vm832_vm2, %v3892_v38, -inf }
 0xe4a   : > { %1804 = vmax.xlane.f32.xlu0 %v1803_v25  ;;  %1807 = vmax.xlane.f32.xlu1 %v1806_v44 }
 0xe4e   : > { %1810 = vmax.xlane.f32.xlu0 %v1809_v30  ;;  %1813 = vmax.xlane.f32.xlu1 %v1812_v40 }
 0xec5   : > { %v1781_v1 = vpop.xlane.xlu1 %1780 }
 0xec6   : > { %v1815_v53 = vsub.f32 %v1733_v27, %v1781_v1 }
 0xec7   : > { %v1784_v51 = vpop.xlane.xlu0 %1783 }
 0xec8   : > { %v1816_v34 = vsub.f32 %v1736_v20, %v1784_v51  ;;  %v1827_v23 = vmul.f32 1.442695, %v1815_v53 }
 0xec9   : > { %v1790_v29 = vpop.xlane.xlu1 %1789 }
 0xeca   : > { %v1818_v13 = vsub.f32 %v1744_v52, %v1790_v29  ;;  %v1829_v28 = vmul.f32 1.442695, %v1816_v34 }
 0xecb   : > { %v1787_v45 = vpop.xlane.xlu0 %1786 }
 0xecc   : > { %v1833_v39 = vmul.f32 1.442695, %v1818_v13  ;;  %v1817_v58 = vsub.f32 %v1741_v33, %v1787_v45 }
 0xece   : > { %3151 = vpow2.f32 %v1833_v39  ;;  %v1831_v26 = vmul.f32 1.442695, %v1817_v58 }
 0xecf   : > { %3153 = vpow2.f32 %v1829_v28  ;;  %v1793_v35 = vpop.xlane.xlu0 %1792  ;;  %v1796_v2 = vpop.xlane.xlu1 %1795 }
 0xed0   : > { %3155 = vpow2.f32 %v1831_v26  ;;  %v1819_v7 = vsub.f32 %v1749_v63, %v1793_v35  ;;  %v1820_v10 = vsub.f32 %v1752_v47, %v1796_v2 }
 0xed1   : > { %3157 = vpow2.f32 %v1827_v23 }
 0xed2   : > { %v1835_v27 = vmul.f32 1.442695, %v1819_v7  ;;  %v1837_v62 = vmul.f32 1.442695, %v1820_v10 }
 0xed3   : > { %v1799_v15 = vpop.xlane.xlu0 %1798  ;;  %v1802_v37 = vpop.xlane.xlu1 %1801 }
 0xed4   : > { %v1821_v20 = vsub.f32 %v1757_v31, %v1799_v15  ;;  %v1822_v17 = vsub.f32 %v1760_v36, %v1802_v37 }
 0xed6   : > { %v1839_v52 = vmul.f32 1.442695, %v1821_v20  ;;  %v1841_v60 = vmul.f32 1.442695, %v1822_v17 }
 0xed7   : > { %v1805_v25 = vpop.xlane.xlu0 %1804  ;;  %v1808_v33 = vpop.xlane.xlu1 %1807 }
 0xed8   : > { %v3902_v44 = vpop.eup %3151  ;;  %3159 = vpow2.f32 %v1839_v52  ;;  %v1823_v31 = vsub.f32 %v3887_v56, %v1805_v25  ;;  %v1824_v36 = vsub.f32 %v3892_v38, %v1808_v33 }
 0xed9   : > { %v3904_v30 = vpop.eup %3153  ;;  %3161 = vpow2.f32 %v1841_v60  ;;  %v1860_v63 = vsel %vm832_vm2, %v3902_v44, 0.0 }
 0xeda   : > { %v3908_v47 = vpop.eup %3155  ;;  %3163 = vpow2.f32 %v1835_v27  ;;  %1861 = vadd.xlane.f32.xlu1 %v1860_v63  ;;  %v1854_v13 = vsel %vm832_vm2, %v3904_v30, 0.0  ;;  %v1843_v28 = vmul.f32 1.442695, %v1823_v31  ;;  %v1845_v56 = vmul.f32 1.442695, %v1824_v36 }
 0xedb   : > { %3165 = vpow2.f32 %v1837_v62  ;;  %v1811_v40 = vpop.xlane.xlu0 %1810  ;;  %v1814_v1 = vpop.xlane.xlu1 %1813  ;;  %v1857_v51 = vsel %vm832_vm2, %v3908_v47, 0.0 }
 0xedc   : > { %v3158_v34 = vpop.eup %3157  ;;  %v1825_v29 = vsub.f32 %v1773_v21, %v1811_v40  ;;  %v1826_v53 = vsub.f32 %v1776_v42, %v1814_v1  ;;  %1858 = vadd.xlane.f32.xlu0 %v1857_v51 }
 0xedd   : > { %v1851_v58 = vsel %vm832_vm2, %v3158_v34, 0.0 }
 0xede   : > { %v1847_v45 = vmul.f32 1.442695, %v1825_v29  ;;  %v1849_v39 = vmul.f32 1.442695, %v1826_v53  ;;  %1855 = vadd.xlane.f32.xlu1 %v1854_v13 }
 0xee0   : > { %3167 = vpow2.f32 %v1847_v45  ;;  %1852 = vadd.xlane.f32.xlu0 %v1851_v58 }
 0xee1   : > { %3169 = vpow2.f32 %v1849_v39 }
 0xee2   : > { %v3917_v38 = vpop.eup %3159  ;;  %3171 = vpow2.f32 %v1843_v28 }
 0xee3   : > { %v3919_v23 = vpop.eup %3161  ;;  %3173 = vpow2.f32 %v1845_v56  ;;  %v1869_v21 = vsel %vm832_vm2, %v3917_v38, 0.0 }
 0xee4   : > { %v3164_v42 = vpop.eup %3163  ;;  %1870 = vadd.xlane.f32.xlu0 %v1869_v21  ;;  %v1872_v26 = vsel %vm832_vm2, %v3919_v23, 0.0 }
 0xee5   : > { %v3166_v35 = vpop.eup %3165  ;;  %1873 = vadd.xlane.f32.xlu1 %v1872_v26  ;;  %v1863_v2 = vsel %vm832_vm2, %v3164_v42, 0.0 }
 0xee6   : > { %v1866_v7 = vsel %vm832_vm2, %v3166_v35, 0.0 }
 0xee8   : > { %1864 = vadd.xlane.f32.xlu0 %v1863_v2 }
 0xee9   : > { %1867 = vadd.xlane.f32.xlu1 %v1866_v7 }
 0xeea   : > { %v3927_v10 = vpop.eup %3167 }
 0xeeb   : > { %v3929_v15 = vpop.eup %3169  ;;  %v1881_v37 = vsel %vm832_vm2, %v3927_v10, 0.0 }
 0xeec   : > { %v3933_v20 = vpop.eup %3171  ;;  %1882 = vadd.xlane.f32.xlu0 %v1881_v37  ;;  %v1884_v17 = vsel %vm832_vm2, %v3929_v15, 0.0 }
 0xeed   : > { %v3937_v27 = vpop.eup %3173  ;;  %1885 = vadd.xlane.f32.xlu1 %v1884_v17  ;;  %v1875_v52 = vsel %vm832_vm2, %v3933_v20, 0.0 }
 0xeee   : > { %v1878_v60 = vsel %vm832_vm2, %v3937_v27, 0.0 }
 0xef0   : > { %1876 = vadd.xlane.f32.xlu0 %v1875_v52 }
 0xef1   : > { %1879 = vadd.xlane.f32.xlu1 %v1878_v60 }
 0xf02   : > { %1919 = vrot.lane.b32.xlu1 %v3788_v24, %s3247_s16 }
 0xf06   : > { %1917 = vrot.lane.b32.xlu0 %v3828_v55, %s3247_s16 }
 0xf67   : > { %v1862_v62 = vpop.xlane.xlu1 %1861 }
 0xf69   : > { %v1859_v25 = vpop.xlane.xlu0 %1858 }
 0xf6b   : > { %v1856_v33 = vpop.xlane.xlu1 %1855 }
 0xf6c   : > { %3175 = vrcp.f32 %v1856_v33 }
 0xf6d   : > { %v1853_v63 = vpop.xlane.xlu0 %1852 }
 0xf6e   : > { %3177 = vrcp.f32 %v1853_v63 }
 0xf6f   : > { %3179 = vrcp.f32 %v1859_v25 }
 0xf71   : > { %v1871_v31 = vpop.xlane.xlu0 %1870 }
 0xf72   : > { %v1874_v36 = vpop.xlane.xlu1 %1873 }
 0xf75   : > { %v1865_v40 = vpop.xlane.xlu0 %1864 }
 0xf76   : > { %v3176_v1 = vpop.eup %3175  ;;  %v1868_v51 = vpop.xlane.xlu1 %1867  ;;  %3181 = vrcp.f32 %v1865_v40 }
 0xf77   : > { %3183 = vrcp.f32 %v1868_v51  ;;  %v1900_v55 = vmul.f32 %v3176_v1, %v3904_v30 }
 0xf78   : > { %v3178_v29 = vpop.eup %3177  ;;  %3185 = vrcp.f32 %v1862_v62 }
 0xf79   : > { %v1883_v24 = vpop.xlane.xlu0 %1882  ;;  %v1899_v53 = vmul.f32 %v3178_v29, %v3158_v34  ;;  %3187 = vrcp.f32 %v1871_v31  ;;  %v3180_v56 = vpop.eup %3179 }
 0xf7a   : > { %v1886_v13 = vpop.xlane.xlu1 %1885  ;;  %3189 = vrcp.f32 %v1874_v36  ;;  %v1901_v30 = vmul.f32 %v3180_v56, %v3908_v47 }
 0xf7b   : > { %v1911_v28 = vpack.c.bf16 %v1900_v55, %v1899_v53 }
 0xf7d   : > { %v1877_v45 = vpop.xlane.xlu0 %1876  ;;  %2955 = vmatprep.mubr.msk.bf16.mxu1 %vm832_vm2, %v1911_v28 }
 0xf7e   : > { %v1880_v39 = vpop.xlane.xlu1 %1879  ;;  %3191 = vrcp.f32 %v1877_v45 }
 0xf7f   : > { %3193 = vrcp.f32 %v1880_v39 }
 0xf80   : > { %v3182_v58 = vpop.eup %3181  ;;  %3195 = vrcp.f32 %v1883_v24 }
 0xf81   : > { %v1918_v21 = vpop.permute.xlu0 %1917  ;;  %v3184_v26 = vpop.eup %3183  ;;  %v1903_v34 = vmul.f32 %v3182_v58, %v3164_v42  ;;  %3197 = vrcp.f32 %v1886_v13 }
 0xf82   : > { %2951 = vmatprep.subr.bf16.mxu1 %v1918_v21  ;;  %v3186_v2 = vpop.eup %3185  ;;  %v1920_v7 = vpop.permute.xlu1 %1919  ;;  %v1904_v37 = vmul.f32 %v3184_v26, %v3166_v35 }
 0xf83   : > { %2952 = vmatpush3.bf16.msra.mxu1 %v1918_v21  ;;  %v1902_v17 = vmul.f32 %v3186_v2, %v3902_v44  ;;  %v1941_v52 = vsel %vm994_vm3, %v1920_v7, 0  ;;  %v3188_v60 = vpop.eup %3187 }
 0xf84   : > { %3016 = vmatprep.subr.msk.bf16.mxu1 %vm994_vm3, %v1920_v7  ;;  %v3190_v62 = vpop.eup %3189  ;;  %v1913_v63 = vpack.c.bf16 %v1904_v37, %v1903_v34  ;;  %v1905_v47 = vmul.f32 %v3188_v60, %v3917_v38  ;;  %v3059_v38 = vld [vmem:[%s4113_s6 + $0x10] sm:$0xff]  }
 0xf85   : > { %v1912_v25 = vpack.c.bf16 %v1902_v17, %v1901_v30  ;;  %v1906_v42 = vmul.f32 %v3190_v62, %v3919_v23  ;;  %v3060_v23 = vld [vmem:[%s4113_s6 + $0x18] sm:$0xff]  }
 0xf87   : > { %2954 = vmatpush3.bf16.msra.mxu1 %v1941_v52  ;;  %v1914_v40 = vpack.c.bf16 %v1906_v42, %v1905_v47 }
 0xf88   : > { %v3192_v33 = vpop.eup %3191  ;;  %2967 = vmatprep.subr.bf16.mxu1 %v3059_v38 }
 0xf89   : > { %v3194_v31 = vpop.eup %3193  ;;  %v1907_v44 = vmul.f32 %v3192_v33, %v3933_v20 }
 0xf8a   : > { %2956 = vmatmul.mubr.msk.bf16.vlgmr.msra.gmra.mrb[28].mxu1 %vm832_vm2, %v1912_v25  ;;  %v1908_v35 = vmul.f32 %v3194_v31, %v3937_v27  ;;  %v3196_v36 = vpop.eup %3195 }
 0xf8b   : > { %2959 = vmatprep.mubr.msk.bf16.mxu1 %vm832_vm2, %v1913_v63  ;;  %v3198_v1 = vpop.eup %3197  ;;  %v1909_v29 = vmul.f32 %v3196_v36, %v3927_v10  ;;  %2968 = vmatpush3.bf16.msra.mxu1 %v3059_v38 }
 0xf8c   : > { %v1915_v51 = vpack.c.bf16 %v1908_v35, %v1907_v44  ;;  %v1910_v24 = vmul.f32 %v3198_v1, %v3929_v15  ;;  %2969 = vmatprep.subr.bf16.mxu1 %v3060_v23 }
 0xf8e   : > { %v1916_v53 = vpack.c.bf16 %v1910_v24, %v1909_v29 }
 0xf8f   : > { %2970 = vmatpush3.bf16.msra.mxu1 %v3060_v23 }
 0xf92   : > { %2960 = vmatmul.mubr.msk.bf16.gmra.mrb[32].mxu1 %vm832_vm2, %v1914_v40 }
 0xf93   : > { %2963 = vmatprep.mubr.msk.bf16.mxu1 %vm832_vm2, %v1915_v51 }
 0xf9a   : > { %2964 = vmatmul.mubr.msk.bf16.gmra.mrb[36].mxu1 %vm832_vm2, %v1916_v53 }
0x105d   : > { %v2957_v20 = vpop.f32.mrb[28].mxu1 }
0x105e   : > { %v1977_v27 = vpop.f32.mrb[29].mxu1 }
0x105f   : > { %v2024_v10 = vmul.f32 %v3807_v46, %v1977_v27  ;;  %v2958_v15 = vpop.f32.mrb[30].mxu1  ;;  %v2026_v46 = vmul.f32 %v3785_v59, %v2957_v20 }
0x1060   : > { %v2027_v55 = vmul.f32 %v3799_v57, %v2958_v15  ;;  %v1980_v13 = vpop.f32.mrb[31].mxu1 }
0x1061   : > { %v2025_v58 = vmul.f32 %v3833_v3, %v1980_v13 }
0x1062   : > { %v2036_v28 = vadd.f32 %v2027_v55, %v2024_v10 }
0x1065   : > { %v2961_v45 = vpop.f32.mrb[32].mxu1 }
0x1066   : > { %v2030_v39 = vmul.f32 %v3819_v5, %v2961_v45  ;;  %v1993_v56 = vpop.f32.mrb[33].mxu1 }
0x1067   : > { %v2028_v21 = vmul.f32 %v3839_v12, %v1993_v56  ;;  %v2962_v26 = vpop.f32.mrb[34].mxu1  ;;  %v3061_v56 = vld [vmem:[%s4114_s7 + $0x10] sm:$0xff]  }
0x1068   : > { %v2039_v2 = vadd.f32 %v2036_v28, %v2030_v39  ;;  %v2031_v7 = vmul.f32 %v3845_v14, %v2962_v26  ;;  %v1996_v30 = vpop.f32.mrb[35].mxu1  ;;  %2975 = vmatprep.subr.bf16.mxu0 %v3061_v56 }
0x1069   : > { %v2037_v34 = vadd.f32 %v2028_v21, %v2025_v58  ;;  %v2029_v57 = vmul.f32 %v3813_v18, %v1996_v30  ;;  %v3062_v58 = vld [vmem:[%s4114_s7 + $0x18] sm:$0xff]   ;;  %2976 = vmatpush3.bf16.msra.mxu0 %v3061_v56 }
0x106a   : > { %2977 = vmatprep.subr.bf16.mxu0 %v3062_v58 }
0x106b   : > { %v2040_v37 = vadd.f32 %v2037_v34, %v2031_v7  ;;  %v2038_v17 = vadd.f32 %v2029_v57, %v2026_v46 }
0x106d   : > { %v2965_v52 = vpop.f32.mrb[36].mxu1  ;;  %2978 = vmatpush3.bf16.msra.mxu0 %v3062_v58 }
0x106e   : > { %v2034_v5 = vmul.f32 %v3851_v61, %v2965_v52  ;;  %v2009_v60 = vpop.f32.mrb[37].mxu1 }
0x106f   : > { %v2032_v3 = vmul.f32 %v3793_v54, %v2009_v60  ;;  %v2966_v62 = vpop.f32.mrb[38].mxu1  ;;  %v2124_v54 = vrot.slane %v3771_v32, %v1177_v49 }
0x1070   : > { %v2043_v12 = vadd.f32 %v2040_v37, %v2034_v5  ;;  %v2035_v25 = vmul.f32 %v3857_v43, %v2966_v62  ;;  %v2012_v33 = vpop.f32.mrb[39].mxu1 }
0x1071   : > { %v2041_v14 = vadd.f32 %v2038_v17, %v2032_v3  ;;  %v2033_v63 = vmul.f32 %v3825_v41, %v2012_v33  ;;  %v2170_v17 = vrot.slane %v3771_v32, %v3672_v6 }
0x1073   : > { %v2044_v59 = vadd.f32 %v2041_v14, %v2035_v25  ;;  %v2042_v31 = vadd.f32 %v2039_v2, %v2033_v63 }
0x1075   : > { %v2046_v47 = vpack.c.bf16 %v2044_v59, %v2044_v59  ;;  %v2045_v18 = vpack.c.bf16 %v2043_v12, %v2042_v31  ;;  %v2177_v12 = vrot.slane %v3771_v32, %v3516_v11  ;;  %v3064_v11 = vld [vmem:[%s4115_s8 + $0x48] sm:$0xff]  }
0x1077   : > { %2971 = vmatprep.mubr.msk.bf16.mxu1 %vm566_vm1, %v2045_v18 }
0x1078   : > { %2972 = vmatmul.mubr.msk.bf16.vlgmr.msra.gmra.mrb[40].mxu1 %vm566_vm1, %v2046_v47 }
0x114b   : > { %v2973_v61 = vpop.f32.mrb[40].mxu1 }
0x114c   : > { %v2104_v42 = vpop.f32.mrb[41].mxu1  ;;  %v2120_v41 = vadd.f32 %v2973_v61, %v3746_v50 }
0x114d   : > { %v2118_v43 = vadd.f32 %v2104_v42, %v3743_v16  ;;  %v2974_v44 = vpop.f32.mrb[42].mxu1  ;;  %v3065_v42 = vld [vmem:[%s4115_s8 + $0x50] sm:$0xff]  }
0x114e   : > { %v2107_v35 = vpop.f32.mrb[43].mxu1  ;;  %v3996_v29 = vadd.f32 %v2124_v54, %v2120_v41  ;;  %v3067_v44 = vld [vmem:[%s4115_s8 + $0x60] sm:$0xff]   ;;  %v3069_v41 = vld [vmem:[%s4115_s8 + $0x70] sm:$0xff]  }
0x114f   : > { %v3989_v36 = vadd.f32 %v2124_v54, %v2118_v43  ;;  %v2119_v40 = vadd.f32 %v2107_v35, %v3748_v19  ;;  %v3066_v43 = vld [vmem:[%s4115_s8 + $0x58] sm:$0xff]   ;;  %v3068_v35 = vld [vmem:[%s4115_s8 + $0x68] sm:$0xff]  }
0x1150   : > { %v2134_v16 = vsel %vm566_vm1, %v3996_v29, 0.0 }
0x1151   : > { %v3992_v1 = vadd.f32 %v2124_v54, %v2119_v40  ;;  %v2128_v51 = vsel %vm566_vm1, %v3989_v36, 0.0  ;;  %v3063_v54 = vld [vmem:[%s4115_s8 + $0x40] sm:$0xff]   ;;  %v3070_v40 = vld [vmem:[%s4115_s8 + $0x78] sm:$0xff]  }
0x1152   : > { %2129 = vadd.xlane.f32.xlu1 %v2128_v51  ;;  %2983 = vmatprep.subr.bf16.mxu1 %v3063_v54  ;;  %v2191_v51 = vrot.slane %v3771_v32, %v1243_v22 }
0x1153   : > { %v2131_v49 = vsel %vm566_vm1, %v3992_v1, 0.0  ;;  %2984 = vmatpush3.bf16.msra.mxu1 %v3063_v54 }
0x1154   : > { %2132 = vadd.xlane.f32.xlu0 %v2131_v49  ;;  %2985 = vmatprep.subr.bf16.mxu1 %v3064_v11 }
0x1157   : > { %2986 = vmatpush3.bf16.msra.mxu1 %v3064_v11 }
0x1158   : > { %2135 = vadd.xlane.f32.xlu0 %v2134_v16  ;;  %2987 = vmatprep.subr.bf16.mxu1 %v3065_v42 }
0x115b   : > { %2988 = vmatpush3.bf16.msra.mxu1 %v3065_v42 }
0x115c   : > { %2989 = vmatprep.subr.bf16.mxu1 %v3066_v43 }
0x115f   : > { %2990 = vmatpush3.bf16.msra.mxu1 %v3066_v43 }
0x1160   : > { %2991 = vmatprep.subr.bf16.mxu1 %v3067_v44 }
0x1163   : > { %2992 = vmatpush3.bf16.msra.mxu1 %v3067_v44 }
0x1164   : > { %2993 = vmatprep.subr.bf16.mxu1 %v3068_v35 }
0x1167   : > { %2994 = vmatpush3.bf16.msra.mxu1 %v3068_v35 }
0x1168   : > { %2995 = vmatprep.subr.bf16.mxu1 %v3069_v41 }
0x116b   : > { %2996 = vmatpush3.bf16.msra.mxu1 %v3069_v41 }
0x116c   : > { %2997 = vmatprep.subr.bf16.mxu1 %v3070_v40 }
0x116f   : > { %2998 = vmatpush3.bf16.msra.mxu1 %v3070_v40 }
0x11df   : > { %v2130_v50 = vpop.xlane.xlu1 %2129 }
0x11e0   : > { %v2137_v24 = vmul.f32 0.03125, %v2130_v50 }
0x11e1   : > { %v2133_v53 = vpop.xlane.xlu0 %2132 }
0x11e2   : > { %v2140_v19 = vsub.f32 %v3989_v36, %v2137_v24  ;;  %v2138_v38 = vmul.f32 0.03125, %v2133_v53 }
0x11e4   : > { %v2141_v23 = vsub.f32 %v3992_v1, %v2138_v38  ;;  %v2143_v20 = vmul.f32 %v2140_v19, %v2140_v19 }
0x11e5   : > { %v2136_v27 = vpop.xlane.xlu0 %2135 }
0x11e6   : > { %v2139_v10 = vmul.f32 0.03125, %v2136_v27  ;;  %v2146_v15 = vsel %vm566_vm1, %v2143_v20, 0.0  ;;  %v2144_v55 = vmul.f32 %v2141_v23, %v2141_v23 }
0x11e7   : > { %2147 = vadd.xlane.f32.xlu1 %v2146_v15 }
0x11e8   : > { %v2142_v13 = vsub.f32 %v3996_v29, %v2139_v10  ;;  %v2149_v28 = vsel %vm566_vm1, %v2144_v55, 0.0 }
0x11e9   : > { %2150 = vadd.xlane.f32.xlu0 %v2149_v28 }
0x11ea   : > { %v2145_v45 = vmul.f32 %v2142_v13, %v2142_v13 }
0x11ec   : > { %v2152_v39 = vsel %vm566_vm1, %v2145_v45, 0.0 }
0x11ed   : > { %2153 = vadd.xlane.f32.xlu1 %v2152_v39 }
0x1274   : > { %v2148_v21 = vpop.xlane.xlu1 %2147 }
0x1275   : > { %v2155_v26 = vmul.f32 0.03125, %v2148_v21 }
0x1276   : > { %v2151_v2 = vpop.xlane.xlu0 %2150 }
0x1277   : > { %v2158_v7 = vadd.f32 1e-06, %v2155_v26  ;;  %v2156_v30 = vmul.f32 0.03125, %v2151_v2 }
0x1279   : > { %3199 = vrsqrt.f32 %v2158_v7  ;;  %v2159_v46 = vadd.f32 1e-06, %v2156_v30 }
0x127a   : > { %v2154_v34 = vpop.xlane.xlu1 %2153 }
0x127b   : > { %3201 = vrsqrt.f32 %v2159_v46  ;;  %v2157_v57 = vmul.f32 0.03125, %v2154_v34 }
0x127d   : > { %v2160_v37 = vadd.f32 1e-06, %v2157_v57 }
0x127f   : > { %3203 = vrsqrt.f32 %v2160_v37 }
0x1283   : > { %v3200_v52 = vpop.eup %3199 }
0x1284   : > { %v2164_v5 = vmul.f32 %v3200_v52, %v2140_v19 }
0x1285   : > { %v3202_v60 = vpop.eup %3201 }
0x1286   : > { %v2165_v3 = vmul.f32 %v3202_v60, %v2141_v23  ;;  %v2171_v62 = vmul.f32 %v2170_v17, %v2164_v5 }
0x1288   : > { %v2172_v25 = vmul.f32 %v2170_v17, %v2165_v3  ;;  %v2178_v63 = vadd.f32 %v2177_v12, %v2171_v62 }
0x1289   : > { %v3204_v33 = vpop.eup %3203 }
0x128a   : > { %v2166_v14 = vmul.f32 %v3204_v33, %v2142_v13  ;;  %v2179_v59 = vadd.f32 %v2177_v12, %v2172_v25 }
0x128c   : > { %v2173_v31 = vmul.f32 %v2170_v17, %v2166_v14  ;;  %v2181_v47 = vpack.c.bf16 %v2179_v59, %v2178_v63 }
0x128e   : > { %2979 = vmatprep.mubr.msk.bf16.mxu0 %vm566_vm1, %v2181_v47  ;;  %v2180_v18 = vadd.f32 %v2177_v12, %v2173_v31 }
0x1290   : > { %v2182_v61 = vpack.c.bf16 %v2180_v18, %v2180_v18 }
0x1292   : > { %2980 = vmatmul.mubr.msk.bf16.vlgmr.msra.gmra.mrb[36].mxu0 %vm566_vm1, %v2182_v61 }
0x1365   : > { %v2981_v49 = vpop.f32.mrb[36].mxu0 }
0x1366   : > { %v4047_v16 = vadd.f32 %v2981_v49, %v2191_v51  ;;  %v2244_v50 = vpop.f32.mrb[37].mxu0 }
0x1367   : > { %v4049_v24 = vadd.f32 %v2244_v50, %v2191_v51  ;;  %v2982_v53 = vpop.f32.mrb[38].mxu0 }
0x1368   : > { %v4052_v19 = vmul.f32 0.70710677, %v4047_v16  ;;  %v2247_v38 = vpop.f32.mrb[39].mxu0 }
0x1369   : > { %v4055_v23 = vmul.f32 0.70710677, %v4049_v24  ;;  %v4057_v20 = vadd.f32 %v2247_v38, %v2191_v51 }
0x136a   : > { %v2272_v27 = vand.u32 2147483647, %v4052_v19  ;;  %vm2266_vm7 = vcmp.ge.f32.partialorder %v4052_v19, 0.0 }
0x136b   : > { %v2270_v22 = vand.u32 2147483647, %v4055_v23  ;;  %v4062_v15 = vmul.f32 0.70710677, %v4057_v20  ;;  %vm2264_vm8 = vcmp.ge.f32.partialorder %v4055_v23, 0.0 }
0x136c   : > { %v2275_v10 = vmul.f32 0.3275911, %v2272_v27  ;;  %v2314_v58 = vsub.f32 0.0, %v2272_v27 }
0x136d   : > { %v2273_v55 = vmul.f32 0.3275911, %v2270_v22  ;;  %v2271_v28 = vand.u32 2147483647, %v4062_v15  ;;  %v2312_v21 = vsub.f32 0.0, %v2270_v22  ;;  %vm2265_vm9 = vcmp.ge.f32.partialorder %v4062_v15, 0.0 }
0x136e   : > { %v2278_v13 = vadd.f32 1.0, %v2275_v10  ;;  %v2317_v2 = vmul.f32 %v2314_v58, %v2272_v27  ;;  %v2267_v58 = vsel %vm2264_vm8, 1.0, %v3248_v8 }
0x136f   : > { %v2276_v45 = vadd.f32 1.0, %v2273_v55  ;;  %v2274_v39 = vmul.f32 0.3275911, %v2271_v28  ;;  %v2313_v7 = vsub.f32 0.0, %v2271_v28  ;;  %v2315_v34 = vmul.f32 %v2312_v21, %v2270_v22 }
0x1370   : > { %3205 = vrcp.f32 %v2278_v13  ;;  %v2322_v52 = vmul.f32 1.442695, %v2317_v2 }
0x1371   : > { %3207 = vrcp.f32 %v2276_v45  ;;  %v2277_v56 = vadd.f32 1.0, %v2274_v39  ;;  %v2316_v60 = vmul.f32 %v2313_v7, %v2271_v28  ;;  %v2318_v62 = vmul.f32 1.442695, %v2315_v34 }
0x1372   : > { %v2269_v45 = vsel %vm2266_vm7, 1.0, %v3248_v8  ;;  %v2268_v7 = vsel %vm2265_vm9, 1.0, %v3248_v8  ;;  %v2258_v34 = vmul.f32 0.5, %v4049_v24  ;;  %v2460_v8 = vrot.slane %v3771_v32, %v1511_v48 }
0x1373   : > { %3209 = vrcp.f32 %v2277_v56  ;;  %v2320_v59 = vmul.f32 1.442695, %v2316_v60 }
0x1374   : > { %3211 = vpow2.f32 %v2322_v52 }
0x1375   : > { %3213 = vpow2.f32 %v2318_v62 }
0x1376   : > { %3215 = vpow2.f32 %v2320_v59 }
0x137a   : > { %v3206_v26 = vpop.eup %3205 }
0x137b   : > { %v3208_v30 = vpop.eup %3207  ;;  %v2287_v46 = vmul.f32 1.0614054, %v3206_v26 }
0x137c   : > { %v2285_v57 = vmul.f32 1.0614054, %v3208_v30 }
0x137d   : > { %v2290_v37 = vadd.f32 -1.4531521, %v2287_v46  ;;  %v3210_v17 = vpop.eup %3209  ;;  %v2260_v46 = vmul.f32 0.5, %v4047_v16 }
0x137e   : > { %v2288_v5 = vadd.f32 -1.4531521, %v2285_v57  ;;  %v2286_v12 = vmul.f32 1.0614054, %v3210_v17  ;;  %v3212_v50 = vpop.eup %3211  ;;  %v2259_v57 = vmul.f32 0.5, %v4057_v20 }
0x137f   : > { %v2293_v3 = vmul.f32 %v3206_v26, %v2290_v37  ;;  %v3214_v38 = vpop.eup %3213 }
0x1380   : > { %v2291_v25 = vmul.f32 %v3208_v30, %v2288_v5  ;;  %v2289_v14 = vadd.f32 -1.4531521, %v2286_v12  ;;  %v3216_v28 = vpop.eup %3215 }
0x1381   : > { %v2296_v33 = vadd.f32 1.4214138, %v2293_v3 }
0x1382   : > { %v2294_v63 = vadd.f32 1.4214138, %v2291_v25  ;;  %v2292_v47 = vmul.f32 %v3210_v17, %v2289_v14 }
0x1383   : > { %v2299_v31 = vmul.f32 %v3206_v26, %v2296_v33 }
0x1384   : > { %v2297_v18 = vmul.f32 %v3208_v30, %v2294_v63  ;;  %v2295_v54 = vadd.f32 1.4214138, %v2292_v47 }
0x1385   : > { %v2302_v61 = vadd.f32 -0.28449672, %v2299_v31 }
0x1386   : > { %v2300_v11 = vadd.f32 -0.28449672, %v2297_v18  ;;  %v2298_v43 = vmul.f32 %v3210_v17, %v2295_v54 }
0x1387   : > { %v2305_v42 = vmul.f32 %v3206_v26, %v2302_v61 }
0x1388   : > { %v2303_v44 = vmul.f32 %v3208_v30, %v2300_v11  ;;  %v2301_v41 = vadd.f32 -0.28449672, %v2298_v43 }
0x1389   : > { %v2308_v35 = vadd.f32 0.2548296, %v2305_v42 }
0x138a   : > { %v2306_v40 = vadd.f32 0.2548296, %v2303_v44  ;;  %v2304_v49 = vmul.f32 %v3210_v17, %v2301_v41 }
0x138b   : > { %v2311_v51 = vmul.f32 %v3206_v26, %v2308_v35 }
0x138c   : > { %v2309_v53 = vmul.f32 %v3208_v30, %v2306_v40  ;;  %v2307_v22 = vadd.f32 0.2548296, %v2304_v49  ;;  %v3071_v40 = vld [vmem:[%s4117_s10] sm:$0xff]  }
0x138d   : > { %v2326_v27 = vmul.f32 %v3212_v50, %v2311_v51  ;;  %3003 = vmatprep.subr.bf16.mxu0 %v3071_v40  ;;  %v3072_v51 = vld [vmem:[%s4117_s10 + $0x8] sm:$0xff]  }
0x138e   : > { %v2324_v10 = vmul.f32 %v3214_v38, %v2309_v53  ;;  %v2310_v13 = vmul.f32 %v3210_v17, %v2307_v22  ;;  %3004 = vmatpush3.bf16.msra.mxu0 %v3071_v40 }
0x138f   : > { %v2329_v55 = vsub.f32 1.0, %v2326_v27  ;;  %3005 = vmatprep.subr.bf16.mxu0 %v3072_v51 }
0x1390   : > { %v2327_v39 = vsub.f32 1.0, %v2324_v10  ;;  %v2325_v21 = vmul.f32 %v3216_v28, %v2310_v13  ;;  %v3236_v28 = vld [vmem:[%s4111_s4] sm:$0xff] }
0x1391   : > { %v2332_v56 = vmul.f32 %v2329_v55, %v2269_v45  ;;  %v2506_v45 = vrot.slane %v3236_v28, %v3405_v4  ;;  %v2526_v4 = vrot.slane %v3236_v28, %v3672_v6 }
0x1392   : > { %v2330_v26 = vmul.f32 %v2327_v39, %v2267_v58  ;;  %v2328_v2 = vsub.f32 1.0, %v2325_v21  ;;  %3006 = vmatpush3.bf16.msra.mxu0 %v3072_v51 }
0x1393   : > { %v2335_v19 = vadd.f32 1.0, %v2332_v56 }
0x1394   : > { %v2333_v30 = vadd.f32 1.0, %v2330_v26  ;;  %v2331_v23 = vmul.f32 %v2328_v2, %v2268_v7  ;;  %v2513_v2 = vrot.slane %v3236_v28, %v3415_v9 }
0x1395   : > { %v2338_v17 = vmul.f32 %v2335_v19, %v2260_v46 }
0x1396   : > { %v2334_v37 = vadd.f32 1.0, %v2331_v23  ;;  %v2336_v52 = vmul.f32 %v2333_v30, %v2258_v34 }
0x1397   : > { %v2340_v15 = vpack.c.bf16 %v2338_v17, %v2338_v17 }
0x1398   : > { %v2337_v5 = vmul.f32 %v2334_v37, %v2259_v57 }
0x139a   : > { %v2339_v60 = vpack.c.bf16 %v2337_v5, %v2336_v52 }
0x139c   : > { %2999 = vmatprep.mubr.bf16.mxu1 %v2339_v60 }
0x139d   : > { %3000 = vmatmul.mubr.bf16.vlgmr.msra.gmra.mrb[44].mxu1 %v2340_v15 }
0x1470   : > { %v3001_v3 = vpop.f32.mrb[44].mxu1 }
0x1471   : > { %v2440_v62 = vpop.f32.mrb[45].mxu1  ;;  %v2456_v16 = vadd.f32 %v3001_v3, %v3996_v29 }
0x1472   : > { %v2454_v24 = vadd.f32 %v2440_v62, %v3989_v36  ;;  %v3002_v12 = vpop.f32.mrb[46].mxu1 }
0x1473   : > { %v2443_v20 = vpop.f32.mrb[47].mxu1  ;;  %v2463_v59 = vadd.f32 %v2460_v8, %v2456_v16 }
0x1474   : > { %v2455_v25 = vadd.f32 %v2443_v20, %v3992_v1  ;;  %v2461_v33 = vadd.f32 %v2460_v8, %v2454_v24 }
0x1475   : > { %v2470_v0 = vsel %vm566_vm1, %v2463_v59, 0.0 }
0x1476   : > { %v2464_v14 = vsel %vm566_vm1, %v2461_v33, 0.0  ;;  %v2462_v63 = vadd.f32 %v2460_v8, %v2455_v25 }
0x1477   : > { %2465 = vadd.xlane.f32.xlu0 %v2464_v14 }
0x1478   : > { %v2467_v31 = vsel %vm566_vm1, %v2462_v63, 0.0 }
0x1479   : > { %2468 = vadd.xlane.f32.xlu1 %v2467_v31 }
0x147b   : > { %2471 = vadd.xlane.f32.xlu0 %v2470_v0 }
0x1504   : > { %v2466_v48 = vpop.xlane.xlu0 %2465 }
0x1505   : > { %v2473_v32 = vmul.f32 0.03125, %v2466_v48 }
0x1506   : > { %v2469_v29 = vpop.xlane.xlu1 %2468 }
0x1507   : > { %v2476_v36 = vsub.f32 %v2461_v33, %v2473_v32  ;;  %v2474_v47 = vmul.f32 0.03125, %v2469_v29 }
0x1508   : > { %v2472_v18 = vpop.xlane.xlu0 %2471 }
0x1509   : > { %v2477_v61 = vsub.f32 %v2462_v63, %v2474_v47  ;;  %v2475_v1 = vmul.f32 0.03125, %v2472_v18  ;;  %v2479_v54 = vmul.f32 %v2476_v36, %v2476_v36 }
0x150b   : > { %v2478_v11 = vsub.f32 %v2463_v59, %v2475_v1  ;;  %v2482_v42 = vsel %vm566_vm1, %v2479_v54, 0.0  ;;  %v2480_v43 = vmul.f32 %v2477_v61, %v2477_v61 }
0x150c   : > { %2483 = vadd.xlane.f32.xlu1 %v2482_v42 }
0x150d   : > { %v2485_v44 = vsel %vm566_vm1, %v2480_v43, 0.0  ;;  %v2481_v35 = vmul.f32 %v2478_v11, %v2478_v11 }
0x150e   : > { %2486 = vadd.xlane.f32.xlu0 %v2485_v44 }
0x150f   : > { %v2488_v41 = vsel %vm566_vm1, %v2481_v35, 0.0 }
0x1510   : > { %2489 = vadd.xlane.f32.xlu1 %v2488_v41 }
0x1599   : > { %v2484_v49 = vpop.xlane.xlu1 %2483 }
0x159a   : > { %v2491_v50 = vmul.f32 0.03125, %v2484_v49 }
0x159b   : > { %v2487_v53 = vpop.xlane.xlu0 %2486 }
0x159c   : > { %v2494_v38 = vadd.f32 1e-06, %v2491_v50  ;;  %v2492_v27 = vmul.f32 0.03125, %v2487_v53 }
0x159d   : > { %v2490_v22 = vpop.xlane.xlu1 %2489 }
0x159e   : > { %3217 = vrsqrt.f32 %v2494_v38  ;;  %v2495_v10 = vadd.f32 1e-06, %v2492_v27  ;;  %v2493_v55 = vmul.f32 0.03125, %v2490_v22 }
0x15a0   : > { %3219 = vrsqrt.f32 %v2495_v10  ;;  %v2496_v13 = vadd.f32 1e-06, %v2493_v55 }
0x15a2   : > { %3221 = vrsqrt.f32 %v2496_v13 }
0x15a8   : > { %v3218_v39 = vpop.eup %3217 }
0x15a9   : > { %v2500_v56 = vmul.f32 %v3218_v39, %v2476_v36 }
0x15aa   : > { %v3220_v58 = vpop.eup %3219 }
0x15ab   : > { %v2501_v21 = vmul.f32 %v3220_v58, %v2477_v61  ;;  %v2507_v26 = vmul.f32 %v2506_v45, %v2500_v56 }
0x15ac   : > { %v3222_v19 = vpop.eup %3221 }
0x15ad   : > { %v2502_v7 = vmul.f32 %v3222_v19, %v2478_v11  ;;  %v2508_v30 = vmul.f32 %v2506_v45, %v2501_v21  ;;  %v2514_v46 = vadd.f32 %v2513_v2, %v2507_v26 }
0x15af   : > { %v2509_v23 = vmul.f32 %v2506_v45, %v2502_v7  ;;  %v2515_v34 = vadd.f32 %v2513_v2, %v2508_v30 }
0x15b1   : > { %v2517_v57 = vpack.c.bf16 %v2515_v34, %v2514_v46  ;;  %v2516_v37 = vadd.f32 %v2513_v2, %v2509_v23 }
0x15b3   : > { %3007 = vmatprep.mubr.msk.bf16.mxu0 %vm566_vm1, %v2517_v57  ;;  %v2518_v17 = vpack.c.bf16 %v2516_v37, %v2516_v37 }
0x15b5   : > { %3008 = vmatmul.mubr.msk.bf16.vlgmr.msra.gmra.mrb[40].mxu0 %vm566_vm1, %v2518_v17 }
0x1688   : > { %v3009_v9 = vpop.f32.mrb[40].mxu0 }
0x1689   : > { %v2588_v52 = vadd.f32 %v3009_v9, %v2526_v4  ;;  %v2579_v5 = vpop.f32.mrb[41].mxu0 }
0x168a   : > { %v2580_v60 = vadd.f32 %v2579_v5, %v2526_v4  ;;  %v3010_v15 = vpop.f32.mrb[42].mxu0 }
0x168b   : > { %2595 = vst [vmem:[%s386_s30 + $0x10] sm:$0xff] %v2588_v52  ;;  %v2582_v3 = vpop.f32.mrb[43].mxu0 }
0x168c   : > { %2593 = vst [vmem:[%s386_s30] sm:$0xff] %v2580_v60  ;;  %v2583_v8 = vadd.f32 %v2582_v3, %v2526_v4 }
0x168e   : > { %2594 = vst [vmem:[%s386_s30 + $0x8] sm:$0xff] %v2583_v8 }
0x168f PF: > { %s21_s17 = sadd.s32 1, %s3243_s17  }
0x1690   : > { %p18_p4 = scmp.ge.s32.totalorder %s21_s17, 4  }
0x1692   :  { %20 = sbr.rel (!%p18_p4) target bundleno = 1 (0x1), region = 99 }

</bundles_post_ra>
